<compile_context>
chip_gen: v5e
topology: v5e:2x2
jax: 0.10.0
libtpu: 0.0.40
codegen_flags: <defaults>
</compile_context>

<pallas_src>
import numpy as np
import jax
import jax.numpy as jnp
from jax.experimental import pallas as pl
from jax.experimental.pallas import tpu as pltpu

KERNEL_SIZE = 15
SIGMA = 2.5


def get_log_kernel(kernel_size: int = KERNEL_SIZE, sigma: float = SIGMA) -> np.ndarray:
    """Deterministic rotationally-symmetric Laplacian-of-Gaussian filter (fspecial-log style)."""
    ax = np.arange(kernel_size, dtype=np.float64) - (kernel_size - 1) / 2.0
    xx, yy = np.meshgrid(ax, ax, indexing="ij")
    r2 = xx ** 2 + yy ** 2
    g = np.exp(-r2 / (2.0 * sigma ** 2))
    log = g * (r2 - 2.0 * sigma ** 2) / (sigma ** 4)
    log = log - log.mean()  # zero-sum normalization
    return log  # float64 numpy


def _decompose_log_kernel(log_np: np.ndarray, H: int, W: int, rel_tol: float = 1e-7):
    """SVD-decompose the LoG kernel (zero-mean separable-Gaussian form => rank<=3)
    into banded shift matrices so the 'same'-padded depthwise conv becomes MXU matmuls:

        conv2d(x, K)  ==  sum_r  A[r] @ Xp @ B[r]

    with Xp the zero-padded plane (Hp, Wp), A[r]: (H, Hp), B[r]: (Wp, W)."""
    K = log_np.shape[0]
    Hp, Wp = H + K - 1, W + K - 1
    u, s, vt = np.linalg.svd(log_np)
    R = max(1, int(np.sum(s > s[0] * rel_tol)))     # == 3 for the zero-mean LoG
    col = u[:, :R] * s[:R]                          # (K, R) column (vertical) filters
    row = vt[:R, :]                                 # (R, K) row (horizontal) filters

    A = np.zeros((R, H, Hp), dtype=np.float64)
    B = np.zeros((R, Wp, W), dtype=np.float64)
    hh = np.arange(H)
    ww = np.arange(W)
    for r in range(R):
        for d in range(K):
            A[r, hh, hh + d] = col[d, r]
            B[r, ww + d, ww] = row[r, d]
    return jnp.asarray(A, jnp.float32), jnp.asarray(B, jnp.float32)


def _planes_per_block(P: int, Hp: int, Wp: int,
                      budget_bytes: int = 4 << 20, max_unroll: int = 16) -> int:
    """Largest divisor of P whose padded-plane block fits the VMEM budget
    (keeps double-buffered inputs well under the 32 MiB scoped default / v7x VMEM)."""
    plane_bytes = Hp * Wp * 4
    best = 1
    for d in range(1, P + 1):
        if P % d == 0 and d <= max_unroll and d * plane_bytes <= budget_bytes:
            best = d
    return best


def _hfen_kernel(a_ref, b_ref, x_ref, out_ref, acc_ref):
    """One block of `ppb` zero-padded diff planes per sequential grid step.

    For each plane:  conv = sum_r A[r] @ Xp @ B[r]   (MXU matmuls, rank<=3 LoG)
    |conv| is accumulated elementwise into the resident VMEM accumulator; the
    cross-lane reduction + scalar store happens only on the last grid step."""
    i = pl.program_id(0)

    @pl.when(i == 0)
    def _():
        acc_ref[...] = jnp.zeros_like(acc_ref)

    R = a_ref.shape[0]
    ppb = x_ref.shape[0]

    local = jnp.zeros(acc_ref.shape, jnp.float32)
    for p in range(ppb):                      # static unroll over planes in the block
        xp = x_ref[p]                         # (Hp, Wp)
        res = jnp.zeros(acc_ref.shape, jnp.float32)
        for r in range(R):                    # static unroll over rank terms (<= 3)
            t = jnp.dot(xp, b_ref[r], preferred_element_type=jnp.float32)         # (Hp, W)
            res = res + jnp.dot(a_ref[r], t, preferred_element_type=jnp.float32)  # (H, W)
        local = local + jnp.abs(res)
    acc_ref[...] += local

    @pl.when(i == pl.num_programs(0) - 1)
    def _():
        out_ref[...] = jnp.sum(acc_ref[...], keepdims=True)


def hfen_loss(img1: jnp.ndarray, img2: jnp.ndarray,
              log_kernel_np: np.ndarray | None = None,
              norm: bool = False) -> jnp.ndarray:
    """HFEN loss with L1 criterion. img1/img2: (N, C, H, W)."""
    if log_kernel_np is None:
        log_kernel_np = get_log_kernel(KERNEL_SIZE, SIGMA)

    N, C, H, W = img1.shape
    K = log_kernel_np.shape[0]
    p = K // 2
    P = N * C
    Hp, Wp = H + 2 * p, W + 2 * p

    # Linearity of depthwise conv: pad/stream a single diff array instead of two images.
    diff = (img1.astype(jnp.float32) - img2.astype(jnp.float32)).reshape(P, H, W)
    xpad = jnp.pad(diff, ((0, 0), (p, p), (p, p)))

    A, B = _decompose_log_kernel(log_kernel_np, H, W)
    R = A.shape[0]

    ppb = _planes_per_block(P, Hp, Wp)
    grid = (P // ppb,)

    total = pl.pallas_call(
        _hfen_kernel,
        out_shape=jax.ShapeDtypeStruct((1, 1), jnp.float32),
        grid_spec=pltpu.PrefetchScalarGridSpec(
            num_scalar_prefetch=0,
            grid=grid,
            in_specs=[
                # Banded LoG factors: constant block index -> DMAed once, resident in VMEM.
                pl.BlockSpec((R, H, Hp), lambda i: (0, 0, 0)),
                pl.BlockSpec((R, Wp, W), lambda i: (0, 0, 0)),
                # ppb padded diff planes per step.
                pl.BlockSpec((ppb, Hp, Wp), lambda i: (i, 0, 0)),
            ],
            out_specs=pl.BlockSpec((1, 1), lambda i: (0, 0)),   # written once, last step
            scratch_shapes=[pltpu.VMEM((H, W), jnp.float32)],   # resident |conv| accumulator
        ),
        compiler_params=pltpu.CompilerParams(
            dimension_semantics=("arbitrary",)),                # sequential accumulation
    )(A, B, xpad)

    # nn.L1Loss() => mean absolute error over all conv output elements.
    loss = total[0, 0] / jnp.float32(P * H * W)
    if norm:
        loss = loss / jnp.linalg.norm(img2.astype(jnp.float32))
    return loss


def _reference_hfen(img1, img2, log_kernel_np):
    """Pure-JAX reference matching the torch module (two depthwise convs + L1 mean)."""
    N, C, H, W = img1.shape
    K = log_kernel_np.shape[0]
    p = K // 2
    w = jnp.broadcast_to(jnp.asarray(log_kernel_np, jnp.float32), (C, 1, K, K))

    def conv(x):
        return jax.lax.conv_general_dilated(
            x.astype(jnp.float32), w, window_strides=(1, 1),
            padding=[(p, p), (p, p)],
            dimension_numbers=("NCHW", "OIHW", "NCHW"),
            feature_group_count=C)

    return jnp.mean(jnp.abs(conv(img1) - conv(img2)))


if __name__ == "__main__":
    key = jax.random.PRNGKey(0)
    k1, k2 = jax.random.split(key)
    img1 = jax.random.uniform(k1, (2, 4, 16, 16), dtype=jnp.float32)
    img2 = jax.random.uniform(k2, (2, 4, 16, 16), dtype=jnp.float32)

    log_kernel_np = get_log_kernel(KERNEL_SIZE, SIGMA)

    loss = hfen_loss(img1, img2, log_kernel_np, norm=False)
    loss = jax.block_until_ready(loss)

    ref = jax.block_until_ready(_reference_hfen(img1, img2, log_kernel_np))
    np.testing.assert_allclose(np.asarray(loss), np.asarray(ref), rtol=5e-4, atol=1e-5)

    print("KERNEL_OK")
</pallas_src>

<mosaic_0001>
module attributes {stable_mosaic.version = 11 : i64} {
  func.func @_hfen_kernel(%arg0: i32, %arg1: memref<3x16x30xf32, #tpu.memory_space<vmem>>, %arg2: memref<3x30x16xf32, #tpu.memory_space<vmem>>, %arg3: memref<8x30x30xf32, #tpu.memory_space<vmem>>, %arg4: memref<1x1xf32, #tpu.memory_space<vmem>>, %arg5: memref<16x16xf32, #tpu.memory_space<vmem>>) attributes {dimension_semantics = [#tpu.dimension_semantics<arbitrary>], iteration_bounds = array<i64: 1>, scalar_prefetch = 0 : i64, scratch_operands = 1 : i64, tpu.core_type = #tpu.core_type<tc>, window_params = [{pipeline_mode = #tpu.pipeline_mode<synchronous>, transform_indices = @transform_0, window_bounds = array<i64: 3, 16, 30>}, {pipeline_mode = #tpu.pipeline_mode<synchronous>, transform_indices = @transform_1, window_bounds = array<i64: 3, 30, 16>}, {transform_indices = @transform_2, window_bounds = array<i64: 8, 30, 30>}, {pipeline_mode = #tpu.pipeline_mode<synchronous>, transform_indices = @transform_3, window_bounds = array<i64: 1, 1>}]} {
    %c0_i32 = arith.constant 0 : i32
    %0 = arith.cmpi eq, %arg0, %c0_i32 : i32
    %1 = arith.extui %0 : i1 to i32
    %c0_i32_0 = arith.constant 0 : i32
    %2 = arith.cmpi ne, %1, %c0_i32_0 : i32
    scf.if %2 {
      %cst_223 = arith.constant 0.000000e+00 : f32
      %218 = vector.broadcast %cst_223 : f32 to vector<16x16xf32>
      %c0_224 = arith.constant 0 : index
      %c0_225 = arith.constant 0 : index
      %219 = vector.load %arg5[%c0_224, %c0_225] : memref<16x16xf32, #tpu.memory_space<vmem>>, vector<16x16xf32>
      tpu.vector_store %arg5[%c0_224, %c0_225], %218 {strides = array<i32>} : memref<16x16xf32, #tpu.memory_space<vmem>>, vector<16x16xf32>,
    } else {
    }
    %cst = arith.constant 0.000000e+00 : f32
    %3 = vector.broadcast %cst : f32 to vector<16x16xf32>
    %c0 = arith.constant 0 : index
    %c0_1 = arith.constant 0 : index
    %c0_2 = arith.constant 0 : index
    %4 = vector.load %arg3[%c0, %c0_1, %c0_2] : memref<8x30x30xf32, #tpu.memory_space<vmem>>, vector<1x30x30xf32>
    %5 = vector.shape_cast %4 : vector<1x30x30xf32> to vector<30x30xf32>
    %cst_3 = arith.constant 0.000000e+00 : f32
    %6 = vector.broadcast %cst_3 : f32 to vector<16x16xf32>
    %c0_4 = arith.constant 0 : index
    %c0_5 = arith.constant 0 : index
    %c0_6 = arith.constant 0 : index
    %7 = vector.load %arg2[%c0_4, %c0_5, %c0_6] : memref<3x30x16xf32, #tpu.memory_space<vmem>>, vector<1x30x16xf32>
    %8 = vector.shape_cast %7 : vector<1x30x16xf32> to vector<30x16xf32>
    %cst_7 = arith.constant dense<0.000000e+00> : vector<30x16xf32>
    %9 = tpu.matmul %5, %8, %cst_7 {dimension_numbers = #tpu.dot_dimension_numbers<[1], [0], [0], [1], [0, 0, 1, 1], [], []>} : vector<30x30xf32>, vector<30x16xf32>, vector<30x16xf32> -> vector<30x16xf32>
    %c0_8 = arith.constant 0 : index
    %c0_9 = arith.constant 0 : index
    %c0_10 = arith.constant 0 : index
    %10 = vector.load %arg1[%c0_8, %c0_9, %c0_10] : memref<3x16x30xf32, #tpu.memory_space<vmem>>, vector<1x16x30xf32>
    %11 = vector.shape_cast %10 : vector<1x16x30xf32> to vector<16x30xf32>
    %cst_11 = arith.constant dense<0.000000e+00> : vector<16x16xf32>
    %12 = tpu.matmul %11, %9, %cst_11 {dimension_numbers = #tpu.dot_dimension_numbers<[1], [0], [0], [1], [0, 0, 1, 1], [], []>} : vector<16x30xf32>, vector<30x16xf32>, vector<16x16xf32> -> vector<16x16xf32>
    %13 = arith.addf %6, %12 : vector<16x16xf32>
    %c1 = arith.constant 1 : index
    %c0_12 = arith.constant 0 : index
    %c0_13 = arith.constant 0 : index
    %14 = vector.load %arg2[%c1, %c0_12, %c0_13] : memref<3x30x16xf32, #tpu.memory_space<vmem>>, vector<1x30x16xf32>
    %15 = vector.shape_cast %14 : vector<1x30x16xf32> to vector<30x16xf32>
    %cst_14 = arith.constant dense<0.000000e+00> : vector<30x16xf32>
    %16 = tpu.matmul %5, %15, %cst_14 {dimension_numbers = #tpu.dot_dimension_numbers<[1], [0], [0], [1], [0, 0, 1, 1], [], []>} : vector<30x30xf32>, vector<30x16xf32>, vector<30x16xf32> -> vector<30x16xf32>
    %c1_15 = arith.constant 1 : index
    %c0_16 = arith.constant 0 : index
    %c0_17 = arith.constant 0 : index
    %17 = vector.load %arg1[%c1_15, %c0_16, %c0_17] : memref<3x16x30xf32, #tpu.memory_space<vmem>>, vector<1x16x30xf32>
    %18 = vector.shape_cast %17 : vector<1x16x30xf32> to vector<16x30xf32>
    %cst_18 = arith.constant dense<0.000000e+00> : vector<16x16xf32>
    %19 = tpu.matmul %18, %16, %cst_18 {dimension_numbers = #tpu.dot_dimension_numbers<[1], [0], [0], [1], [0, 0, 1, 1], [], []>} : vector<16x30xf32>, vector<30x16xf32>, vector<16x16xf32> -> vector<16x16xf32>
    %20 = arith.addf %13, %19 : vector<16x16xf32>
    %c2 = arith.constant 2 : index
    %c0_19 = arith.constant 0 : index
    %c0_20 = arith.constant 0 : index
    %21 = vector.load %arg2[%c2, %c0_19, %c0_20] : memref<3x30x16xf32, #tpu.memory_space<vmem>>, vector<1x30x16xf32>
    %22 = vector.shape_cast %21 : vector<1x30x16xf32> to vector<30x16xf32>
    %cst_21 = arith.constant dense<0.000000e+00> : vector<30x16xf32>
    %23 = tpu.matmul %5, %22, %cst_21 {dimension_numbers = #tpu.dot_dimension_numbers<[1], [0], [0], [1], [0, 0, 1, 1], [], []>} : vector<30x30xf32>, vector<30x16xf32>, vector<30x16xf32> -> vector<30x16xf32>
    %c2_22 = arith.constant 2 : index
    %c0_23 = arith.constant 0 : index
    %c0_24 = arith.constant 0 : index
    %24 = vector.load %arg1[%c2_22, %c0_23, %c0_24] : memref<3x16x30xf32, #tpu.memory_space<vmem>>, vector<1x16x30xf32>
    %25 = vector.shape_cast %24 : vector<1x16x30xf32> to vector<16x30xf32>
    %cst_25 = arith.constant dense<0.000000e+00> : vector<16x16xf32>
    %26 = tpu.matmul %25, %23, %cst_25 {dimension_numbers = #tpu.dot_dimension_numbers<[1], [0], [0], [1], [0, 0, 1, 1], [], []>} : vector<16x30xf32>, vector<30x16xf32>, vector<16x16xf32> -> vector<16x16xf32>
    %27 = arith.addf %20, %26 : vector<16x16xf32>
    %28 = math.absf %27 : vector<16x16xf32>
    %29 = arith.addf %3, %28 : vector<16x16xf32>
    %c1_26 = arith.constant 1 : index
    %c0_27 = arith.constant 0 : index
    %c0_28 = arith.constant 0 : index
    %30 = vector.load %arg3[%c1_26, %c0_27, %c0_28] : memref<8x30x30xf32, #tpu.memory_space<vmem>>, vector<1x30x30xf32>
    %31 = vector.shape_cast %30 : vector<1x30x30xf32> to vector<30x30xf32>
    %cst_29 = arith.constant 0.000000e+00 : f32
    %32 = vector.broadcast %cst_29 : f32 to vector<16x16xf32>
    %c0_30 = arith.constant 0 : index
    %c0_31 = arith.constant 0 : index
    %c0_32 = arith.constant 0 : index
    %33 = vector.load %arg2[%c0_30, %c0_31, %c0_32] : memref<3x30x16xf32, #tpu.memory_space<vmem>>, vector<1x30x16xf32>
    %34 = vector.shape_cast %33 : vector<1x30x16xf32> to vector<30x16xf32>
    %cst_33 = arith.constant dense<0.000000e+00> : vector<30x16xf32>
    %35 = tpu.matmul %31, %34, %cst_33 {dimension_numbers = #tpu.dot_dimension_numbers<[1], [0], [0], [1], [0, 0, 1, 1], [], []>} : vector<30x30xf32>, vector<30x16xf32>, vector<30x16xf32> -> vector<30x16xf32>
    %c0_34 = arith.constant 0 : index
    %c0_35 = arith.constant 0 : index
    %c0_36 = arith.constant 0 : index
    %36 = vector.load %arg1[%c0_34, %c0_35, %c0_36] : memref<3x16x30xf32, #tpu.memory_space<vmem>>, vector<1x16x30xf32>
    %37 = vector.shape_cast %36 : vector<1x16x30xf32> to vector<16x30xf32>
    %cst_37 = arith.constant dense<0.000000e+00> : vector<16x16xf32>
    %38 = tpu.matmul %37, %35, %cst_37 {dimension_numbers = #tpu.dot_dimension_numbers<[1], [0], [0], [1], [0, 0, 1, 1], [], []>} : vector<16x30xf32>, vector<30x16xf32>, vector<16x16xf32> -> vector<16x16xf32>
    %39 = arith.addf %32, %38 : vector<16x16xf32>
    %c1_38 = arith.constant 1 : index
    %c0_39 = arith.constant 0 : index
    %c0_40 = arith.constant 0 : index
    %40 = vector.load %arg2[%c1_38, %c0_39, %c0_40] : memref<3x30x16xf32, #tpu.memory_space<vmem>>, vector<1x30x16xf32>
    %41 = vector.shape_cast %40 : vector<1x30x16xf32> to vector<30x16xf32>
    %cst_41 = arith.constant dense<0.000000e+00> : vector<30x16xf32>
    %42 = tpu.matmul %31, %41, %cst_41 {dimension_numbers = #tpu.dot_dimension_numbers<[1], [0], [0], [1], [0, 0, 1, 1], [], []>} : vector<30x30xf32>, vector<30x16xf32>, vector<30x16xf32> -> vector<30x16xf32>
    %c1_42 = arith.constant 1 : index
    %c0_43 = arith.constant 0 : index
    %c0_44 = arith.constant 0 : index
    %43 = vector.load %arg1[%c1_42, %c0_43, %c0_44] : memref<3x16x30xf32, #tpu.memory_space<vmem>>, vector<1x16x30xf32>
    %44 = vector.shape_cast %43 : vector<1x16x30xf32> to vector<16x30xf32>
    %cst_45 = arith.constant dense<0.000000e+00> : vector<16x16xf32>
    %45 = tpu.matmul %44, %42, %cst_45 {dimension_numbers = #tpu.dot_dimension_numbers<[1], [0], [0], [1], [0, 0, 1, 1], [], []>} : vector<16x30xf32>, vector<30x16xf32>, vector<16x16xf32> -> vector<16x16xf32>
    %46 = arith.addf %39, %45 : vector<16x16xf32>
    %c2_46 = arith.constant 2 : index
    %c0_47 = arith.constant 0 : index
    %c0_48 = arith.constant 0 : index
    %47 = vector.load %arg2[%c2_46, %c0_47, %c0_48] : memref<3x30x16xf32, #tpu.memory_space<vmem>>, vector<1x30x16xf32>
    %48 = vector.shape_cast %47 : vector<1x30x16xf32> to vector<30x16xf32>
    %cst_49 = arith.constant dense<0.000000e+00> : vector<30x16xf32>
    %49 = tpu.matmul %31, %48, %cst_49 {dimension_numbers = #tpu.dot_dimension_numbers<[1], [0], [0], [1], [0, 0, 1, 1], [], []>} : vector<30x30xf32>, vector<30x16xf32>, vector<30x16xf32> -> vector<30x16xf32>
    %c2_50 = arith.constant 2 : index
    %c0_51 = arith.constant 0 : index
    %c0_52 = arith.constant 0 : index
    %50 = vector.load %arg1[%c2_50, %c0_51, %c0_52] : memref<3x16x30xf32, #tpu.memory_space<vmem>>, vector<1x16x30xf32>
    %51 = vector.shape_cast %50 : vector<1x16x30xf32> to vector<16x30xf32>
    %cst_53 = arith.constant dense<0.000000e+00> : vector<16x16xf32>
    %52 = tpu.matmul %51, %49, %cst_53 {dimension_numbers = #tpu.dot_dimension_numbers<[1], [0], [0], [1], [0, 0, 1, 1], [], []>} : vector<16x30xf32>, vector<30x16xf32>, vector<16x16xf32> -> vector<16x16xf32>
    %53 = arith.addf %46, %52 : vector<16x16xf32>
    %54 = math.absf %53 : vector<16x16xf32>
    %55 = arith.addf %29, %54 : vector<16x16xf32>
    %c2_54 = arith.constant 2 : index
    %c0_55 = arith.constant 0 : index
    %c0_56 = arith.constant 0 : index
    %56 = vector.load %arg3[%c2_54, %c0_55, %c0_56] : memref<8x30x30xf32, #tpu.memory_space<vmem>>, vector<1x30x30xf32>
    %57 = vector.shape_cast %56 : vector<1x30x30xf32> to vector<30x30xf32>
    %cst_57 = arith.constant 0.000000e+00 : f32
    %58 = vector.broadcast %cst_57 : f32 to vector<16x16xf32>
    %c0_58 = arith.constant 0 : index
    %c0_59 = arith.constant 0 : index
    %c0_60 = arith.constant 0 : index
    %59 = vector.load %arg2[%c0_58, %c0_59, %c0_60] : memref<3x30x16xf32, #tpu.memory_space<vmem>>, vector<1x30x16xf32>
    %60 = vector.shape_cast %59 : vector<1x30x16xf32> to vector<30x16xf32>
    %cst_61 = arith.constant dense<0.000000e+00> : vector<30x16xf32>
    %61 = tpu.matmul %57, %60, %cst_61 {dimension_numbers = #tpu.dot_dimension_numbers<[1], [0], [0], [1], [0, 0, 1, 1], [], []>} : vector<30x30xf32>, vector<30x16xf32>, vector<30x16xf32> -> vector<30x16xf32>
    %c0_62 = arith.constant 0 : index
    %c0_63 = arith.constant 0 : index
    %c0_64 = arith.constant 0 : index
    %62 = vector.load %arg1[%c0_62, %c0_63, %c0_64] : memref<3x16x30xf32, #tpu.memory_space<vmem>>, vector<1x16x30xf32>
    %63 = vector.shape_cast %62 : vector<1x16x30xf32> to vector<16x30xf32>
    %cst_65 = arith.constant dense<0.000000e+00> : vector<16x16xf32>
    %64 = tpu.matmul %63, %61, %cst_65 {dimension_numbers = #tpu.dot_dimension_numbers<[1], [0], [0], [1], [0, 0, 1, 1], [], []>} : vector<16x30xf32>, vector<30x16xf32>, vector<16x16xf32> -> vector<16x16xf32>
    %65 = arith.addf %58, %64 : vector<16x16xf32>
    %c1_66 = arith.constant 1 : index
    %c0_67 = arith.constant 0 : index
    %c0_68 = arith.constant 0 : index
    %66 = vector.load %arg2[%c1_66, %c0_67, %c0_68] : memref<3x30x16xf32, #tpu.memory_space<vmem>>, vector<1x30x16xf32>
    %67 = vector.shape_cast %66 : vector<1x30x16xf32> to vector<30x16xf32>
    %cst_69 = arith.constant dense<0.000000e+00> : vector<30x16xf32>
    %68 = tpu.matmul %57, %67, %cst_69 {dimension_numbers = #tpu.dot_dimension_numbers<[1], [0], [0], [1], [0, 0, 1, 1], [], []>} : vector<30x30xf32>, vector<30x16xf32>, vector<30x16xf32> -> vector<30x16xf32>
    %c1_70 = arith.constant 1 : index
    %c0_71 = arith.constant 0 : index
    %c0_72 = arith.constant 0 : index
    %69 = vector.load %arg1[%c1_70, %c0_71, %c0_72] : memref<3x16x30xf32, #tpu.memory_space<vmem>>, vector<1x16x30xf32>
    %70 = vector.shape_cast %69 : vector<1x16x30xf32> to vector<16x30xf32>
    %cst_73 = arith.constant dense<0.000000e+00> : vector<16x16xf32>
    %71 = tpu.matmul %70, %68, %cst_73 {dimension_numbers = #tpu.dot_dimension_numbers<[1], [0], [0], [1], [0, 0, 1, 1], [], []>} : vector<16x30xf32>, vector<30x16xf32>, vector<16x16xf32> -> vector<16x16xf32>
    %72 = arith.addf %65, %71 : vector<16x16xf32>
    %c2_74 = arith.constant 2 : index
    %c0_75 = arith.constant 0 : index
    %c0_76 = arith.constant 0 : index
    %73 = vector.load %arg2[%c2_74, %c0_75, %c0_76] : memref<3x30x16xf32, #tpu.memory_space<vmem>>, vector<1x30x16xf32>
    %74 = vector.shape_cast %73 : vector<1x30x16xf32> to vector<30x16xf32>
    %cst_77 = arith.constant dense<0.000000e+00> : vector<30x16xf32>
    %75 = tpu.matmul %57, %74, %cst_77 {dimension_numbers = #tpu.dot_dimension_numbers<[1], [0], [0], [1], [0, 0, 1, 1], [], []>} : vector<30x30xf32>, vector<30x16xf32>, vector<30x16xf32> -> vector<30x16xf32>
    %c2_78 = arith.constant 2 : index
    %c0_79 = arith.constant 0 : index
    %c0_80 = arith.constant 0 : index
    %76 = vector.load %arg1[%c2_78, %c0_79, %c0_80] : memref<3x16x30xf32, #tpu.memory_space<vmem>>, vector<1x16x30xf32>
    %77 = vector.shape_cast %76 : vector<1x16x30xf32> to vector<16x30xf32>
    %cst_81 = arith.constant dense<0.000000e+00> : vector<16x16xf32>
    %78 = tpu.matmul %77, %75, %cst_81 {dimension_numbers = #tpu.dot_dimension_numbers<[1], [0], [0], [1], [0, 0, 1, 1], [], []>} : vector<16x30xf32>, vector<30x16xf32>, vector<16x16xf32> -> vector<16x16xf32>
    %79 = arith.addf %72, %78 : vector<16x16xf32>
    %80 = math.absf %79 : vector<16x16xf32>
    %81 = arith.addf %55, %80 : vector<16x16xf32>
    %c3 = arith.constant 3 : index
    %c0_82 = arith.constant 0 : index
    %c0_83 = arith.constant 0 : index
    %82 = vector.load %arg3[%c3, %c0_82, %c0_83] : memref<8x30x30xf32, #tpu.memory_space<vmem>>, vector<1x30x30xf32>
    %83 = vector.shape_cast %82 : vector<1x30x30xf32> to vector<30x30xf32>
    %cst_84 = arith.constant 0.000000e+00 : f32
    %84 = vector.broadcast %cst_84 : f32 to vector<16x16xf32>
    %c0_85 = arith.constant 0 : index
    %c0_86 = arith.constant 0 : index
    %c0_87 = arith.constant 0 : index
    %85 = vector.load %arg2[%c0_85, %c0_86, %c0_87] : memref<3x30x16xf32, #tpu.memory_space<vmem>>, vector<1x30x16xf32>
    %86 = vector.shape_cast %85 : vector<1x30x16xf32> to vector<30x16xf32>
    %cst_88 = arith.constant dense<0.000000e+00> : vector<30x16xf32>
    %87 = tpu.matmul %83, %86, %cst_88 {dimension_numbers = #tpu.dot_dimension_numbers<[1], [0], [0], [1], [0, 0, 1, 1], [], []>} : vector<30x30xf32>, vector<30x16xf32>, vector<30x16xf32> -> vector<30x16xf32>
    %c0_89 = arith.constant 0 : index
    %c0_90 = arith.constant 0 : index
    %c0_91 = arith.constant 0 : index
    %88 = vector.load %arg1[%c0_89, %c0_90, %c0_91] : memref<3x16x30xf32, #tpu.memory_space<vmem>>, vector<1x16x30xf32>
    %89 = vector.shape_cast %88 : vector<1x16x30xf32> to vector<16x30xf32>
    %cst_92 = arith.constant dense<0.000000e+00> : vector<16x16xf32>
    %90 = tpu.matmul %89, %87, %cst_92 {dimension_numbers = #tpu.dot_dimension_numbers<[1], [0], [0], [1], [0, 0, 1, 1], [], []>} : vector<16x30xf32>, vector<30x16xf32>, vector<16x16xf32> -> vector<16x16xf32>
    %91 = arith.addf %84, %90 : vector<16x16xf32>
    %c1_93 = arith.constant 1 : index
    %c0_94 = arith.constant 0 : index
    %c0_95 = arith.constant 0 : index
    %92 = vector.load %arg2[%c1_93, %c0_94, %c0_95] : memref<3x30x16xf32, #tpu.memory_space<vmem>>, vector<1x30x16xf32>
    %93 = vector.shape_cast %92 : vector<1x30x16xf32> to vector<30x16xf32>
    %cst_96 = arith.constant dense<0.000000e+00> : vector<30x16xf32>
    %94 = tpu.matmul %83, %93, %cst_96 {dimension_numbers = #tpu.dot_dimension_numbers<[1], [0], [0], [1], [0, 0, 1, 1], [], []>} : vector<30x30xf32>, vector<30x16xf32>, vector<30x16xf32> -> vector<30x16xf32>
    %c1_97 = arith.constant 1 : index
    %c0_98 = arith.constant 0 : index
    %c0_99 = arith.constant 0 : index
    %95 = vector.load %arg1[%c1_97, %c0_98, %c0_99] : memref<3x16x30xf32, #tpu.memory_space<vmem>>, vector<1x16x30xf32>
    %96 = vector.shape_cast %95 : vector<1x16x30xf32> to vector<16x30xf32>
    %cst_100 = arith.constant dense<0.000000e+00> : vector<16x16xf32>
    %97 = tpu.matmul %96, %94, %cst_100 {dimension_numbers = #tpu.dot_dimension_numbers<[1], [0], [0], [1], [0, 0, 1, 1], [], []>} : vector<16x30xf32>, vector<30x16xf32>, vector<16x16xf32> -> vector<16x16xf32>
    %98 = arith.addf %91, %97 : vector<16x16xf32>
    %c2_101 = arith.constant 2 : index
    %c0_102 = arith.constant 0 : index
    %c0_103 = arith.constant 0 : index
    %99 = vector.load %arg2[%c2_101, %c0_102, %c0_103] : memref<3x30x16xf32, #tpu.memory_space<vmem>>, vector<1x30x16xf32>
    %100 = vector.shape_cast %99 : vector<1x30x16xf32> to vector<30x16xf32>
    %cst_104 = arith.constant dense<0.000000e+00> : vector<30x16xf32>
    %101 = tpu.matmul %83, %100, %cst_104 {dimension_numbers = #tpu.dot_dimension_numbers<[1], [0], [0], [1], [0, 0, 1, 1], [], []>} : vector<30x30xf32>, vector<30x16xf32>, vector<30x16xf32> -> vector<30x16xf32>
    %c2_105 = arith.constant 2 : index
    %c0_106 = arith.constant 0 : index
    %c0_107 = arith.constant 0 : index
    %102 = vector.load %arg1[%c2_105, %c0_106, %c0_107] : memref<3x16x30xf32, #tpu.memory_space<vmem>>, vector<1x16x30xf32>
    %103 = vector.shape_cast %102 : vector<1x16x30xf32> to vector<16x30xf32>
    %cst_108 = arith.constant dense<0.000000e+00> : vector<16x16xf32>
    %104 = tpu.matmul %103, %101, %cst_108 {dimension_numbers = #tpu.dot_dimension_numbers<[1], [0], [0], [1], [0, 0, 1, 1], [], []>} : vector<16x30xf32>, vector<30x16xf32>, vector<16x16xf32> -> vector<16x16xf32>
    %105 = arith.addf %98, %104 : vector<16x16xf32>
    %106 = math.absf %105 : vector<16x16xf32>
    %107 = arith.addf %81, %106 : vector<16x16xf32>
    %c4 = arith.constant 4 : index
    %c0_109 = arith.constant 0 : index
    %c0_110 = arith.constant 0 : index
    %108 = vector.load %arg3[%c4, %c0_109, %c0_110] : memref<8x30x30xf32, #tpu.memory_space<vmem>>, vector<1x30x30xf32>
    %109 = vector.shape_cast %108 : vector<1x30x30xf32> to vector<30x30xf32>
    %cst_111 = arith.constant 0.000000e+00 : f32
    %110 = vector.broadcast %cst_111 : f32 to vector<16x16xf32>
    %c0_112 = arith.constant 0 : index
    %c0_113 = arith.constant 0 : index
    %c0_114 = arith.constant 0 : index
    %111 = vector.load %arg2[%c0_112, %c0_113, %c0_114] : memref<3x30x16xf32, #tpu.memory_space<vmem>>, vector<1x30x16xf32>
    %112 = vector.shape_cast %111 : vector<1x30x16xf32> to vector<30x16xf32>
    %cst_115 = arith.constant dense<0.000000e+00> : vector<30x16xf32>
    %113 = tpu.matmul %109, %112, %cst_115 {dimension_numbers = #tpu.dot_dimension_numbers<[1], [0], [0], [1], [0, 0, 1, 1], [], []>} : vector<30x30xf32>, vector<30x16xf32>, vector<30x16xf32> -> vector<30x16xf32>
    %c0_116 = arith.constant 0 : index
    %c0_117 = arith.constant 0 : index
    %c0_118 = arith.constant 0 : index
    %114 = vector.load %arg1[%c0_116, %c0_117, %c0_118] : memref<3x16x30xf32, #tpu.memory_space<vmem>>, vector<1x16x30xf32>
    %115 = vector.shape_cast %114 : vector<1x16x30xf32> to vector<16x30xf32>
    %cst_119 = arith.constant dense<0.000000e+00> : vector<16x16xf32>
    %116 = tpu.matmul %115, %113, %cst_119 {dimension_numbers = #tpu.dot_dimension_numbers<[1], [0], [0], [1], [0, 0, 1, 1], [], []>} : vector<16x30xf32>, vector<30x16xf32>, vector<16x16xf32> -> vector<16x16xf32>
    %117 = arith.addf %110, %116 : vector<16x16xf32>
    %c1_120 = arith.constant 1 : index
    %c0_121 = arith.constant 0 : index
    %c0_122 = arith.constant 0 : index
    %118 = vector.load %arg2[%c1_120, %c0_121, %c0_122] : memref<3x30x16xf32, #tpu.memory_space<vmem>>, vector<1x30x16xf32>
    %119 = vector.shape_cast %118 : vector<1x30x16xf32> to vector<30x16xf32>
    %cst_123 = arith.constant dense<0.000000e+00> : vector<30x16xf32>
    %120 = tpu.matmul %109, %119, %cst_123 {dimension_numbers = #tpu.dot_dimension_numbers<[1], [0], [0], [1], [0, 0, 1, 1], [], []>} : vector<30x30xf32>, vector<30x16xf32>, vector<30x16xf32> -> vector<30x16xf32>
    %c1_124 = arith.constant 1 : index
    %c0_125 = arith.constant 0 : index
    %c0_126 = arith.constant 0 : index
    %121 = vector.load %arg1[%c1_124, %c0_125, %c0_126] : memref<3x16x30xf32, #tpu.memory_space<vmem>>, vector<1x16x30xf32>
    %122 = vector.shape_cast %121 : vector<1x16x30xf32> to vector<16x30xf32>
    %cst_127 = arith.constant dense<0.000000e+00> : vector<16x16xf32>
    %123 = tpu.matmul %122, %120, %cst_127 {dimension_numbers = #tpu.dot_dimension_numbers<[1], [0], [0], [1], [0, 0, 1, 1], [], []>} : vector<16x30xf32>, vector<30x16xf32>, vector<16x16xf32> -> vector<16x16xf32>
    %124 = arith.addf %117, %123 : vector<16x16xf32>
    %c2_128 = arith.constant 2 : index
    %c0_129 = arith.constant 0 : index
    %c0_130 = arith.constant 0 : index
    %125 = vector.load %arg2[%c2_128, %c0_129, %c0_130] : memref<3x30x16xf32, #tpu.memory_space<vmem>>, vector<1x30x16xf32>
    %126 = vector.shape_cast %125 : vector<1x30x16xf32> to vector<30x16xf32>
    %cst_131 = arith.constant dense<0.000000e+00> : vector<30x16xf32>
    %127 = tpu.matmul %109, %126, %cst_131 {dimension_numbers = #tpu.dot_dimension_numbers<[1], [0], [0], [1], [0, 0, 1, 1], [], []>} : vector<30x30xf32>, vector<30x16xf32>, vector<30x16xf32> -> vector<30x16xf32>
    %c2_132 = arith.constant 2 : index
    %c0_133 = arith.constant 0 : index
    %c0_134 = arith.constant 0 : index
    %128 = vector.load %arg1[%c2_132, %c0_133, %c0_134] : memref<3x16x30xf32, #tpu.memory_space<vmem>>, vector<1x16x30xf32>
    %129 = vector.shape_cast %128 : vector<1x16x30xf32> to vector<16x30xf32>
    %cst_135 = arith.constant dense<0.000000e+00> : vector<16x16xf32>
    %130 = tpu.matmul %129, %127, %cst_135 {dimension_numbers = #tpu.dot_dimension_numbers<[1], [0], [0], [1], [0, 0, 1, 1], [], []>} : vector<16x30xf32>, vector<30x16xf32>, vector<16x16xf32> -> vector<16x16xf32>
    %131 = arith.addf %124, %130 : vector<16x16xf32>
    %132 = math.absf %131 : vector<16x16xf32>
    %133 = arith.addf %107, %132 : vector<16x16xf32>
    %c5 = arith.constant 5 : index
    %c0_136 = arith.constant 0 : index
    %c0_137 = arith.constant 0 : index
    %134 = vector.load %arg3[%c5, %c0_136, %c0_137] : memref<8x30x30xf32, #tpu.memory_space<vmem>>, vector<1x30x30xf32>
    %135 = vector.shape_cast %134 : vector<1x30x30xf32> to vector<30x30xf32>
    %cst_138 = arith.constant 0.000000e+00 : f32
    %136 = vector.broadcast %cst_138 : f32 to vector<16x16xf32>
    %c0_139 = arith.constant 0 : index
    %c0_140 = arith.constant 0 : index
    %c0_141 = arith.constant 0 : index
    %137 = vector.load %arg2[%c0_139, %c0_140, %c0_141] : memref<3x30x16xf32, #tpu.memory_space<vmem>>, vector<1x30x16xf32>
    %138 = vector.shape_cast %137 : vector<1x30x16xf32> to vector<30x16xf32>
    %cst_142 = arith.constant dense<0.000000e+00> : vector<30x16xf32>
    %139 = tpu.matmul %135, %138, %cst_142 {dimension_numbers = #tpu.dot_dimension_numbers<[1], [0], [0], [1], [0, 0, 1, 1], [], []>} : vector<30x30xf32>, vector<30x16xf32>, vector<30x16xf32> -> vector<30x16xf32>
    %c0_143 = arith.constant 0 : index
    %c0_144 = arith.constant 0 : index
    %c0_145 = arith.constant 0 : index
    %140 = vector.load %arg1[%c0_143, %c0_144, %c0_145] : memref<3x16x30xf32, #tpu.memory_space<vmem>>, vector<1x16x30xf32>
    %141 = vector.shape_cast %140 : vector<1x16x30xf32> to vector<16x30xf32>
    %cst_146 = arith.constant dense<0.000000e+00> : vector<16x16xf32>
    %142 = tpu.matmul %141, %139, %cst_146 {dimension_numbers = #tpu.dot_dimension_numbers<[1], [0], [0], [1], [0, 0, 1, 1], [], []>} : vector<16x30xf32>, vector<30x16xf32>, vector<16x16xf32> -> vector<16x16xf32>
    %143 = arith.addf %136, %142 : vector<16x16xf32>
    %c1_147 = arith.constant 1 : index
    %c0_148 = arith.constant 0 : index
    %c0_149 = arith.constant 0 : index
    %144 = vector.load %arg2[%c1_147, %c0_148, %c0_149] : memref<3x30x16xf32, #tpu.memory_space<vmem>>, vector<1x30x16xf32>
    %145 = vector.shape_cast %144 : vector<1x30x16xf32> to vector<30x16xf32>
    %cst_150 = arith.constant dense<0.000000e+00> : vector<30x16xf32>
    %146 = tpu.matmul %135, %145, %cst_150 {dimension_numbers = #tpu.dot_dimension_numbers<[1], [0], [0], [1], [0, 0, 1, 1], [], []>} : vector<30x30xf32>, vector<30x16xf32>, vector<30x16xf32> -> vector<30x16xf32>
    %c1_151 = arith.constant 1 : index
    %c0_152 = arith.constant 0 : index
    %c0_153 = arith.constant 0 : index
    %147 = vector.load %arg1[%c1_151, %c0_152, %c0_153] : memref<3x16x30xf32, #tpu.memory_space<vmem>>, vector<1x16x30xf32>
    %148 = vector.shape_cast %147 : vector<1x16x30xf32> to vector<16x30xf32>
    %cst_154 = arith.constant dense<0.000000e+00> : vector<16x16xf32>
    %149 = tpu.matmul %148, %146, %cst_154 {dimension_numbers = #tpu.dot_dimension_numbers<[1], [0], [0], [1], [0, 0, 1, 1], [], []>} : vector<16x30xf32>, vector<30x16xf32>, vector<16x16xf32> -> vector<16x16xf32>
    %150 = arith.addf %143, %149 : vector<16x16xf32>
    %c2_155 = arith.constant 2 : index
    %c0_156 = arith.constant 0 : index
    %c0_157 = arith.constant 0 : index
    %151 = vector.load %arg2[%c2_155, %c0_156, %c0_157] : memref<3x30x16xf32, #tpu.memory_space<vmem>>, vector<1x30x16xf32>
    %152 = vector.shape_cast %151 : vector<1x30x16xf32> to vector<30x16xf32>
    %cst_158 = arith.constant dense<0.000000e+00> : vector<30x16xf32>
    %153 = tpu.matmul %135, %152, %cst_158 {dimension_numbers = #tpu.dot_dimension_numbers<[1], [0], [0], [1], [0, 0, 1, 1], [], []>} : vector<30x30xf32>, vector<30x16xf32>, vector<30x16xf32> -> vector<30x16xf32>
    %c2_159 = arith.constant 2 : index
    %c0_160 = arith.constant 0 : index
    %c0_161 = arith.constant 0 : index
    %154 = vector.load %arg1[%c2_159, %c0_160, %c0_161] : memref<3x16x30xf32, #tpu.memory_space<vmem>>, vector<1x16x30xf32>
    %155 = vector.shape_cast %154 : vector<1x16x30xf32> to vector<16x30xf32>
    %cst_162 = arith.constant dense<0.000000e+00> : vector<16x16xf32>
    %156 = tpu.matmul %155, %153, %cst_162 {dimension_numbers = #tpu.dot_dimension_numbers<[1], [0], [0], [1], [0, 0, 1, 1], [], []>} : vector<16x30xf32>, vector<30x16xf32>, vector<16x16xf32> -> vector<16x16xf32>
    %157 = arith.addf %150, %156 : vector<16x16xf32>
    %158 = math.absf %157 : vector<16x16xf32>
    %159 = arith.addf %133, %158 : vector<16x16xf32>
    %c6 = arith.constant 6 : index
    %c0_163 = arith.constant 0 : index
    %c0_164 = arith.constant 0 : index
    %160 = vector.load %arg3[%c6, %c0_163, %c0_164] : memref<8x30x30xf32, #tpu.memory_space<vmem>>, vector<1x30x30xf32>
    %161 = vector.shape_cast %160 : vector<1x30x30xf32> to vector<30x30xf32>
    %cst_165 = arith.constant 0.000000e+00 : f32
    %162 = vector.broadcast %cst_165 : f32 to vector<16x16xf32>
    %c0_166 = arith.constant 0 : index
    %c0_167 = arith.constant 0 : index
    %c0_168 = arith.constant 0 : index
    %163 = vector.load %arg2[%c0_166, %c0_167, %c0_168] : memref<3x30x16xf32, #tpu.memory_space<vmem>>, vector<1x30x16xf32>
    %164 = vector.shape_cast %163 : vector<1x30x16xf32> to vector<30x16xf32>
    %cst_169 = arith.constant dense<0.000000e+00> : vector<30x16xf32>
    %165 = tpu.matmul %161, %164, %cst_169 {dimension_numbers = #tpu.dot_dimension_numbers<[1], [0], [0], [1], [0, 0, 1, 1], [], []>} : vector<30x30xf32>, vector<30x16xf32>, vector<30x16xf32> -> vector<30x16xf32>
    %c0_170 = arith.constant 0 : index
    %c0_171 = arith.constant 0 : index
    %c0_172 = arith.constant 0 : index
    %166 = vector.load %arg1[%c0_170, %c0_171, %c0_172] : memref<3x16x30xf32, #tpu.memory_space<vmem>>, vector<1x16x30xf32>
    %167 = vector.shape_cast %166 : vector<1x16x30xf32> to vector<16x30xf32>
    %cst_173 = arith.constant dense<0.000000e+00> : vector<16x16xf32>
    %168 = tpu.matmul %167, %165, %cst_173 {dimension_numbers = #tpu.dot_dimension_numbers<[1], [0], [0], [1], [0, 0, 1, 1], [], []>} : vector<16x30xf32>, vector<30x16xf32>, vector<16x16xf32> -> vector<16x16xf32>
    %169 = arith.addf %162, %168 : vector<16x16xf32>
    %c1_174 = arith.constant 1 : index
    %c0_175 = arith.constant 0 : index
    %c0_176 = arith.constant 0 : index
    %170 = vector.load %arg2[%c1_174, %c0_175, %c0_176] : memref<3x30x16xf32, #tpu.memory_space<vmem>>, vector<1x30x16xf32>
    %171 = vector.shape_cast %170 : vector<1x30x16xf32> to vector<30x16xf32>
    %cst_177 = arith.constant dense<0.000000e+00> : vector<30x16xf32>
    %172 = tpu.matmul %161, %171, %cst_177 {dimension_numbers = #tpu.dot_dimension_numbers<[1], [0], [0], [1], [0, 0, 1, 1], [], []>} : vector<30x30xf32>, vector<30x16xf32>, vector<30x16xf32> -> vector<30x16xf32>
    %c1_178 = arith.constant 1 : index
    %c0_179 = arith.constant 0 : index
    %c0_180 = arith.constant 0 : index
    %173 = vector.load %arg1[%c1_178, %c0_179, %c0_180] : memref<3x16x30xf32, #tpu.memory_space<vmem>>, vector<1x16x30xf32>
    %174 = vector.shape_cast %173 : vector<1x16x30xf32> to vector<16x30xf32>
    %cst_181 = arith.constant dense<0.000000e+00> : vector<16x16xf32>
    %175 = tpu.matmul %174, %172, %cst_181 {dimension_numbers = #tpu.dot_dimension_numbers<[1], [0], [0], [1], [0, 0, 1, 1], [], []>} : vector<16x30xf32>, vector<30x16xf32>, vector<16x16xf32> -> vector<16x16xf32>
    %176 = arith.addf %169, %175 : vector<16x16xf32>
    %c2_182 = arith.constant 2 : index
    %c0_183 = arith.constant 0 : index
    %c0_184 = arith.constant 0 : index
    %177 = vector.load %arg2[%c2_182, %c0_183, %c0_184] : memref<3x30x16xf32, #tpu.memory_space<vmem>>, vector<1x30x16xf32>
    %178 = vector.shape_cast %177 : vector<1x30x16xf32> to vector<30x16xf32>
    %cst_185 = arith.constant dense<0.000000e+00> : vector<30x16xf32>
    %179 = tpu.matmul %161, %178, %cst_185 {dimension_numbers = #tpu.dot_dimension_numbers<[1], [0], [0], [1], [0, 0, 1, 1], [], []>} : vector<30x30xf32>, vector<30x16xf32>, vector<30x16xf32> -> vector<30x16xf32>
    %c2_186 = arith.constant 2 : index
    %c0_187 = arith.constant 0 : index
    %c0_188 = arith.constant 0 : index
    %180 = vector.load %arg1[%c2_186, %c0_187, %c0_188] : memref<3x16x30xf32, #tpu.memory_space<vmem>>, vector<1x16x30xf32>
    %181 = vector.shape_cast %180 : vector<1x16x30xf32> to vector<16x30xf32>
    %cst_189 = arith.constant dense<0.000000e+00> : vector<16x16xf32>
    %182 = tpu.matmul %181, %179, %cst_189 {dimension_numbers = #tpu.dot_dimension_numbers<[1], [0], [0], [1], [0, 0, 1, 1], [], []>} : vector<16x30xf32>, vector<30x16xf32>, vector<16x16xf32> -> vector<16x16xf32>
    %183 = arith.addf %176, %182 : vector<16x16xf32>
    %184 = math.absf %183 : vector<16x16xf32>
    %185 = arith.addf %159, %184 : vector<16x16xf32>
    %c7 = arith.constant 7 : index
    %c0_190 = arith.constant 0 : index
    %c0_191 = arith.constant 0 : index
    %186 = vector.load %arg3[%c7, %c0_190, %c0_191] : memref<8x30x30xf32, #tpu.memory_space<vmem>>, vector<1x30x30xf32>
    %187 = vector.shape_cast %186 : vector<1x30x30xf32> to vector<30x30xf32>
    %cst_192 = arith.constant 0.000000e+00 : f32
    %188 = vector.broadcast %cst_192 : f32 to vector<16x16xf32>
    %c0_193 = arith.constant 0 : index
    %c0_194 = arith.constant 0 : index
    %c0_195 = arith.constant 0 : index
    %189 = vector.load %arg2[%c0_193, %c0_194, %c0_195] : memref<3x30x16xf32, #tpu.memory_space<vmem>>, vector<1x30x16xf32>
    %190 = vector.shape_cast %189 : vector<1x30x16xf32> to vector<30x16xf32>
    %cst_196 = arith.constant dense<0.000000e+00> : vector<30x16xf32>
    %191 = tpu.matmul %187, %190, %cst_196 {dimension_numbers = #tpu.dot_dimension_numbers<[1], [0], [0], [1], [0, 0, 1, 1], [], []>} : vector<30x30xf32>, vector<30x16xf32>, vector<30x16xf32> -> vector<30x16xf32>
    %c0_197 = arith.constant 0 : index
    %c0_198 = arith.constant 0 : index
    %c0_199 = arith.constant 0 : index
    %192 = vector.load %arg1[%c0_197, %c0_198, %c0_199] : memref<3x16x30xf32, #tpu.memory_space<vmem>>, vector<1x16x30xf32>
    %193 = vector.shape_cast %192 : vector<1x16x30xf32> to vector<16x30xf32>
    %cst_200 = arith.constant dense<0.000000e+00> : vector<16x16xf32>
    %194 = tpu.matmul %193, %191, %cst_200 {dimension_numbers = #tpu.dot_dimension_numbers<[1], [0], [0], [1], [0, 0, 1, 1], [], []>} : vector<16x30xf32>, vector<30x16xf32>, vector<16x16xf32> -> vector<16x16xf32>
    %195 = arith.addf %188, %194 : vector<16x16xf32>
    %c1_201 = arith.constant 1 : index
    %c0_202 = arith.constant 0 : index
    %c0_203 = arith.constant 0 : index
    %196 = vector.load %arg2[%c1_201, %c0_202, %c0_203] : memref<3x30x16xf32, #tpu.memory_space<vmem>>, vector<1x30x16xf32>
    %197 = vector.shape_cast %196 : vector<1x30x16xf32> to vector<30x16xf32>
    %cst_204 = arith.constant dense<0.000000e+00> : vector<30x16xf32>
    %198 = tpu.matmul %187, %197, %cst_204 {dimension_numbers = #tpu.dot_dimension_numbers<[1], [0], [0], [1], [0, 0, 1, 1], [], []>} : vector<30x30xf32>, vector<30x16xf32>, vector<30x16xf32> -> vector<30x16xf32>
    %c1_205 = arith.constant 1 : index
    %c0_206 = arith.constant 0 : index
    %c0_207 = arith.constant 0 : index
    %199 = vector.load %arg1[%c1_205, %c0_206, %c0_207] : memref<3x16x30xf32, #tpu.memory_space<vmem>>, vector<1x16x30xf32>
    %200 = vector.shape_cast %199 : vector<1x16x30xf32> to vector<16x30xf32>
    %cst_208 = arith.constant dense<0.000000e+00> : vector<16x16xf32>
    %201 = tpu.matmul %200, %198, %cst_208 {dimension_numbers = #tpu.dot_dimension_numbers<[1], [0], [0], [1], [0, 0, 1, 1], [], []>} : vector<16x30xf32>, vector<30x16xf32>, vector<16x16xf32> -> vector<16x16xf32>
    %202 = arith.addf %195, %201 : vector<16x16xf32>
    %c2_209 = arith.constant 2 : index
    %c0_210 = arith.constant 0 : index
    %c0_211 = arith.constant 0 : index
    %203 = vector.load %arg2[%c2_209, %c0_210, %c0_211] : memref<3x30x16xf32, #tpu.memory_space<vmem>>, vector<1x30x16xf32>
    %204 = vector.shape_cast %203 : vector<1x30x16xf32> to vector<30x16xf32>
    %cst_212 = arith.constant dense<0.000000e+00> : vector<30x16xf32>
    %205 = tpu.matmul %187, %204, %cst_212 {dimension_numbers = #tpu.dot_dimension_numbers<[1], [0], [0], [1], [0, 0, 1, 1], [], []>} : vector<30x30xf32>, vector<30x16xf32>, vector<30x16xf32> -> vector<30x16xf32>
    %c2_213 = arith.constant 2 : index
    %c0_214 = arith.constant 0 : index
    %c0_215 = arith.constant 0 : index
    %206 = vector.load %arg1[%c2_213, %c0_214, %c0_215] : memref<3x16x30xf32, #tpu.memory_space<vmem>>, vector<1x16x30xf32>
    %207 = vector.shape_cast %206 : vector<1x16x30xf32> to vector<16x30xf32>
    %cst_216 = arith.constant dense<0.000000e+00> : vector<16x16xf32>
    %208 = tpu.matmul %207, %205, %cst_216 {dimension_numbers = #tpu.dot_dimension_numbers<[1], [0], [0], [1], [0, 0, 1, 1], [], []>} : vector<16x30xf32>, vector<30x16xf32>, vector<16x16xf32> -> vector<16x16xf32>
    %209 = arith.addf %202, %208 : vector<16x16xf32>
    %210 = math.absf %209 : vector<16x16xf32>
    %211 = arith.addf %185, %210 : vector<16x16xf32>
    %c0_217 = arith.constant 0 : index
    %c0_218 = arith.constant 0 : index
    %212 = vector.load %arg5[%c0_217, %c0_218] : memref<16x16xf32, #tpu.memory_space<vmem>>, vector<16x16xf32>
    %213 = arith.addf %212, %211 : vector<16x16xf32>
    %c0_219 = arith.constant 0 : index
    %c0_220 = arith.constant 0 : index
    %214 = vector.load %arg5[%c0_219, %c0_220] : memref<16x16xf32, #tpu.memory_space<vmem>>, vector<16x16xf32>
    tpu.vector_store %arg5[%c0_219, %c0_220], %213 {strides = array<i32>} : memref<16x16xf32, #tpu.memory_space<vmem>>, vector<16x16xf32>,
    %c0_i32_221 = arith.constant 0 : i32
    %215 = arith.cmpi eq, %arg0, %c0_i32_221 : i32
    %216 = arith.extui %215 : i1 to i32
    %c0_i32_222 = arith.constant 0 : i32
    %217 = arith.cmpi ne, %216, %c0_i32_222 : i32
    scf.if %217 {
      %c0_223 = arith.constant 0 : index
      %c0_224 = arith.constant 0 : index
      %218 = vector.load %arg5[%c0_223, %c0_224] : memref<16x16xf32, #tpu.memory_space<vmem>>, vector<16x16xf32>
      %219 = vector.shape_cast %218 : vector<16x16xf32> to vector<1x16x16xf32>
      %cst_225 = arith.constant dense<0.000000e+00> : vector<1xf32>
      %220 = vector.multi_reduction <add>, %219, %cst_225 [1, 2] : vector<1x16x16xf32> to vector<1xf32>
      %221 = vector.shape_cast %220 : vector<1xf32> to vector<1x1x1xf32>
      %222 = vector.extract %221[0, 0, 0] : f32 from vector<1x1x1xf32>
      %223 = vector.broadcast %222 : f32 to vector<1x1xf32>
      %c0_226 = arith.constant 0 : index
      %c0_227 = arith.constant 0 : index
      %224 = vector.load %arg4[%c0_226, %c0_227] : memref<1x1xf32, #tpu.memory_space<vmem>>, vector<1x1xf32>
      tpu.vector_store %arg4[%c0_226, %c0_227], %223 {strides = array<i32>} : memref<1x1xf32, #tpu.memory_space<vmem>>, vector<1x1xf32>,
    } else {
    }
    return
  }
  func.func @transform_0(%arg0: i32) -> (i32, i32, i32) {
    %c0_i32 = arith.constant 0 : i32
    %c0_i32_0 = arith.constant 0 : i32
    %c0_i32_1 = arith.constant 0 : i32
    %c0_i32_2 = arith.constant 0 : i32
    return %c0_i32, %c0_i32_0, %c0_i32_1 : i32, i32, i32
  }
  func.func @transform_1(%arg0: i32) -> (i32, i32, i32) {
    %c0_i32 = arith.constant 0 : i32
    %c0_i32_0 = arith.constant 0 : i32
    %c0_i32_1 = arith.constant 0 : i32
    %c0_i32_2 = arith.constant 0 : i32
    return %c0_i32, %c0_i32_0, %c0_i32_1 : i32, i32, i32
  }
  func.func @transform_2(%arg0: i32) -> (i32, i32, i32) {
    %c0_i32 = arith.constant 0 : i32
    %c0_i32_0 = arith.constant 0 : i32
    %c0_i32_1 = arith.constant 0 : i32
    return %arg0, %c0_i32, %c0_i32_0 : i32, i32, i32
  }
  func.func @transform_3(%arg0: i32) -> (i32, i32) {
    %c0_i32 = arith.constant 0 : i32
    %c0_i32_0 = arith.constant 0 : i32
    %c0_i32_1 = arith.constant 0 : i32
    return %c0_i32, %c0_i32_0 : i32, i32
  }
}

</mosaic_0001>

<bundles_post_ra>
// kernel: tpu_custom_call.1
= control target key start
LH: loop header
LB: loop body
LE: loop exit
PB: predicated region body
PF: predicated region fallthrough
CT: control target
= control target key end

     0   :  { %vm43_vm0 = vcmask 1045504   ;;  %s2658_s0 = inlined_call_operand.vmem [shape: f32[3,16,30], index: 0, kind: input, shape index: {}]   ;;  %s2659_s1 = inlined_call_operand.vmem [shape: f32[3,30,16], index: 1, kind: input, shape index: {}]   ;;  %s2660_s2 = inlined_call_operand.vmem [shape: f32[8,30,30], index: 2, kind: input, shape index: {}]   ;;  %s2661_s3 = inlined_call_operand.hbm [shape: f32[1,1], index: 3, kind: output, shape index: {}]  }
   0x1   :  { %v1910_v0 = vld [vmem:[%s2659_s1 + $0x18] sm:$0x3f]  ;;  %v1920_v2 = vld [vmem:[%s2659_s1 + $0x10] sm:$0xff]  ;;  %v1934_v4 = vld [vmem:[%s2659_s1 + $0x8] sm:$0xff] }
   0x2   :  { %v1915_v1 = vld [vmem:[%s2659_s1 + $0x38] sm:$0x3f]  ;;  %1619 = vmatpush.msk.msra.mxu0 %vm43_vm0, %v1910_v0  ;;  %v1929_v3 = vld [vmem:[%s2659_s1 + $0x30] sm:$0xff]  ;;  %v1939_v5 = vld [vmem:[%s2659_s1 + $0x28] sm:$0xff] }
   0x3   :  { %1851 = vmatpush.msk.msra.mxu3 %vm43_vm0, %v1915_v1  ;;  %1628 = vmatpush.msk.msra.mxu1 %vm43_vm0, %v1915_v1  ;;  %v1948_v6 = vld [vmem:[%s2659_s1] sm:$0xff] }
   0x4   :  { %60 = vmatpush.msra.mxu0 %v1920_v2  ;;  %v1953_v7 = vld [vmem:[%s2659_s1 + $0x20] sm:$0xff] }
   0x5   :  { %1852 = vmatpush.msra.mxu3 %v1929_v3  ;;  %99 = vmatpush.msra.mxu1 %v1929_v3 }
   0x6   :  { %8 = vsyncpa [#allocation4], 0  ;;  %61 = vmatpush.msra.mxu0 %v1934_v4  ;;  %v1961_v8 = vld [vmem:[%s2660_s2] sm:$0xff]  ;;  %vm30_vm1 = vcmask 244736   ;;  %v1966_v9 = vld [vmem:[%s2660_s2 + $0x10] sm:$0xff]  ;;  %vm19_vm2 = vcmask 130048  }
   0x7   :  { %1853 = vmatpush.msra.mxu3 %v1939_v5  ;;  %100 = vmatpush.msra.mxu1 %v1939_v5  ;;  %v23_v10 = vld [vmem:[%s2660_s2 + $0x8] sm:$0xff]  ;;  %v25_v11 = vld [vmem:[%s2660_s2 + $0x18] sm:$0x3f]  ;;  %v2008_v16 = vld [vmem:[%s2660_s2 + $0x20] sm:$0xff]  ;;  %s1610_s29 = sshll.u32 %s2661_s3, 4  ;;  %vm1601_vm3 = vcmask 0   ;;  %s1611_s29 = int_to_ptr.hbm [resolvable:$true] %s1610_s29 }
   0x8   :  { %62 = vmatpush.msra.mxu0 %v1948_v6  ;;  %v2018_v20 = vld [vmem:[%s2658_s0 + $0x10] sm:$0xff]  ;;  %v2023_v21 = vld [vmem:[%s2659_s1 + $0x58] sm:$0x3f]  ;;  %v2028_v22 = vld [vmem:[%s2660_s2 + $0x28] sm:$0xff] }
   0x9   :  { %1854 = vmatpush.msra.mxu3 %v1953_v7  ;;  %1620 = vmatmul.msk.f32.vlgmr.msra.gmra.mxu0 %vm30_vm1, %v1961_v8  ;;  %v2035_v23 = vld [vmem:[%s2659_s1 + $0x50] sm:$0xff]  ;;  %v2046_v25 = vld [vmem:[%s2659_s1 + $0x48] sm:$0xff]  ;;  %v2053_v26 = vld [vmem:[%s2659_s1 + $0x40] sm:$0xff] }
   0xa   :  { %1631 = vmatmul.msk.f32.vlgmr.msra.gmra.mxu3 %vm30_vm1, %v1966_v9  ;;  %101 = vmatpush.msra.mxu1 %v1953_v7  ;;  %v2058_v27 = vld [vmem:[%s2658_s0 + $0x18] sm:$0xff]  ;;  %v2064_v28 = vld [vmem:[%s2658_s0] sm:$0xff]  ;;  %v2070_v29 = vld [vmem:[%s2660_s2 + $0x30] sm:$0xff] }
   0xb   :  { %1659 = vmatpush.msk.msrb.mxu0 %vm43_vm0, %v1910_v0  ;;  %1629 = vmatmul.msk.f32.vlgmr.msra.gmra.mxu1 %vm30_vm1, %v1961_v8  ;;  %v2083_v30 = vld [vmem:[%s2660_s2 + $0x38] sm:$0x3f]  ;;  %v2088_v31 = vld [vmem:[%s2658_s0 + $0x8] sm:$0xff]  ;;  %v2125_v45 = vld [vmem:[%s2658_s0 + $0x20] sm:$0xff] }
   0xc   :  { %1664 = vmatpush.msk.msrb.mxu1 %vm43_vm0, %v1915_v1  ;;  %v2132_v47 = vld [vmem:[%s2660_s2 + $0x40] sm:$0xff]  ;;  %v2142_v48 = vld [vmem:[%s2658_s0 + $0x28] sm:$0xff]  ;;  %v2165_v50 = vld [vmem:[%s2660_s2 + $0x50] sm:$0xff] }
   0xd   :  { %290 = vmatpush.msrb.mxu0 %v1920_v2  ;;  %v2149_v49 = vld [vmem:[%s2660_s2 + $0x48] sm:$0xff]  ;;  %v2176_v51 = vld [vmem:[%s2660_s2 + $0x58] sm:$0x3f] }
   0xe   :  { %319 = vmatpush.msrb.mxu1 %v1929_v3 }
   0xf   :  { %291 = vmatpush.msrb.mxu0 %v1934_v4 }
  0x10   :  { %320 = vmatpush.msrb.mxu1 %v1939_v5 }
  0x11   :  { %292 = vmatpush.msrb.mxu0 %v1948_v6 }
  0x12   :  { %1621 = vmatmul.msk.f32.gmra.mxu0 %vm30_vm1, %v23_v10  ;;  %1632 = vmatmul.msk.f32.gmra.mxu3 %vm30_vm1, %v25_v11 }
  0x13   :  { %321 = vmatpush.msrb.mxu1 %v1953_v7 }
  0x14   :  { %1630 = vmatmul.msk.f32.gmra.mxu1 %vm30_vm1, %v23_v10 }
  0x15   :  { %1687 = vmatpush.msk.msra.mxu1 %vm43_vm0, %v1910_v0 }
  0x17   :  { %478 = vmatpush.msra.mxu1 %v1920_v2 }
  0x19   :  { %479 = vmatpush.msra.mxu1 %v1934_v4 }
  0x1a   :  { %1622 = vmatmul.msk.f32.gmra.mxu0 %vm30_vm1, %v1966_v9 }
  0x1b   :  { %480 = vmatpush.msra.mxu1 %v1948_v6 }
  0x1c   :  { %1665 = vmatmul.msk.f32.vlgmr.msrb.gmra.mxu1 %vm30_vm1, %v2008_v16 }
  0x22   :  { %1623 = vmatmul.msk.f32.gmra.mxu0 %vm30_vm1, %v25_v11 }
  0x24   :  { %1666 = vmatmul.msk.f32.gmra.mxu1 %vm30_vm1, %v2028_v22 }
  0x2a   :  { %1660 = vmatmul.msk.f32.vlgmr.msrb.gmra.mxu0 %vm30_vm1, %v2008_v16 }
  0x2c   :  { %1667 = vmatmul.msk.f32.gmra.mxu1 %vm30_vm1, %v2070_v29 }
  0x32   :  { %1661 = vmatmul.msk.f32.gmra.mxu0 %vm30_vm1, %v2028_v22 }
  0x34   :  { %1668 = vmatmul.msk.f32.gmra.mxu1 %vm30_vm1, %v2083_v30 }
  0x3a   :  { %1662 = vmatmul.msk.f32.gmra.mxu0 %vm30_vm1, %v2070_v29 }
  0x3c   :  { %1688 = vmatmul.msk.f32.vlgmr.msra.gmra.mxu1 %vm30_vm1, %v2132_v47 }
  0x42   :  { %1663 = vmatmul.msk.f32.gmra.mxu0 %vm30_vm1, %v2083_v30 }
  0x44   :  { %1689 = vmatmul.msk.f32.gmra.mxu1 %vm30_vm1, %v2149_v49 }
  0x4c   :  { %1690 = vmatmul.msk.f32.gmra.mxu1 %vm30_vm1, %v2165_v50 }
  0x54   :  { %1691 = vmatmul.msk.f32.gmra.mxu1 %vm30_vm1, %v2176_v51 }
  0x86   :  { %v64_v12 = vpop.f32.mrf.mxu0 }
  0x88   :  { %v103_v14 = vpop.f32.mrf.mxu1 }
  0x8d   :  { %v109_v13 = vpop.f32.mrf.mxu3 }
  0x8f   :  { %v67_v15 = vpop.f32.mrf.mxu0 }
  0x91   :  { %v106_v19 = vpop.f32.mrf.mxu1 }
  0x95   :  { %v112_v17 = vpop.f32.mrf.mxu3 }
  0x96   :  { %1635 = vmatpush.msk.msra.mxu2 %vm43_vm0, %v112_v17  ;;  %v2236_v17 = vld [vmem:[%s2660_s2 + $0x68] sm:$0xff] }
  0x97   :  { %v70_v18 = vpop.f32.mrf.mxu0 }
  0x98   :  { %140 = vmatpush.msra.mxu2 %v109_v13 }
  0x99   :  { %v323_v39 = vpop.f32.mrf.mxu1 }
  0x9a   :  { %141 = vmatpush.msra.mxu2 %v106_v19  ;;  %v2264_v19 = vld [vmem:[%s2660_s2 + $0x78] sm:$0x3f] }
  0x9c   :  { %142 = vmatpush.msra.mxu2 %v103_v14 }
  0x9d   :  { %1636 = vmatmul.msk.f32.vlgmr.msra.gmra.mxu2 %vm30_vm1, %v2018_v20 }
  0x9e   :  { %1645 = vmatpush.msk.msrb.mxu2 %vm43_vm0, %v2023_v21 }
  0x9f   :  { %v73_v24 = vpop.f32.mrf.mxu0 }
  0xa0   :  { %1638 = vmatpush.msk.msrb.mxu3 %vm43_vm0, %v73_v24  ;;  %203 = vmatpush.msrb.mxu2 %v2035_v23 }
  0xa1   :  { %v326_v41 = vpop.f32.mrf.mxu1 }
  0xa2   :  { %172 = vmatpush.msrb.mxu3 %v70_v18  ;;  %204 = vmatpush.msrb.mxu2 %v2046_v25  ;;  %v2248_v18 = vld [vmem:[%s2660_s2 + $0x70] sm:$0xff] }
  0xa4   :  { %173 = vmatpush.msrb.mxu3 %v67_v15  ;;  %205 = vmatpush.msrb.mxu2 %v2053_v26  ;;  %v2224_v15 = vld [vmem:[%s2660_s2 + $0x60] sm:$0xff] }
  0xa5   :  { %1637 = vmatmul.msk.f32.gmra.mxu2 %vm30_vm1, %v2058_v27 }
  0xa6   :  { %174 = vmatpush.msrb.mxu3 %v64_v12 }
  0xa7   :  { %1639 = vmatmul.msk.f32.vlgmr.msrb.gmra.mxu3 %vm30_vm1, %v2064_v28  ;;  %v294_v32 = vpop.f32.mrf.mxu0 }
  0xa9   :  { %v329_v43 = vpop.f32.mrf.mxu1 }
  0xad   :  { %1646 = vmatmul.msk.f32.vlgmr.msrb.gmra.mxu2 %vm30_vm1, %v1961_v8 }
  0xaf   :  { %1640 = vmatmul.msk.f32.gmra.mxu3 %vm30_vm1, %v2088_v31  ;;  %v297_v33 = vpop.f32.mrf.mxu0 }
  0xb1   :  { %v332_v46 = vpop.f32.mrf.mxu1 }
  0xb5   :  { %1647 = vmatmul.msk.f32.gmra.mxu2 %vm30_vm1, %v23_v10 }
  0xb7   :  { %v300_v35 = vpop.f32.mrf.mxu0 }
  0xb9   :  { %v482_v54 = vpop.f32.mrf.mxu1 }
  0xbd   :  { %1648 = vmatmul.msk.f32.gmra.mxu2 %vm30_vm1, %v1966_v9 }
  0xbf   :  { %v303_v37 = vpop.f32.mrf.mxu0 }
  0xc0   :  { %1672 = vmatpush.msk.msra.mxu2 %vm43_vm0, %v303_v37 }
  0xc1   :  { %v485_v56 = vpop.f32.mrf.mxu1 }
  0xc2   :  { %377 = vmatpush.msra.mxu2 %v300_v35 }
  0xc4   :  { %378 = vmatpush.msra.mxu2 %v297_v33 }
  0xc5   :  { %1649 = vmatmul.msk.f32.gmra.mxu2 %vm30_vm1, %v25_v11 }
  0xc6   :  { %379 = vmatpush.msra.mxu2 %v294_v32 }
  0xc8   :  { %1692 = vmatpush.msk.msrb.mxu2 %vm43_vm0, %v1915_v1 }
  0xc9   :  { %v488_v58 = vpop.f32.mrf.mxu1 }
  0xca   :  { %507 = vmatpush.msrb.mxu2 %v1929_v3 }
  0xcc   :  { %508 = vmatpush.msrb.mxu2 %v1939_v5 }
  0xcd   :  { %1673 = vmatmul.msk.f32.vlgmr.msra.gmra.mxu2 %vm30_vm1, %v2064_v28 }
  0xce   :  { %509 = vmatpush.msrb.mxu2 %v1953_v7 }
  0xd0   :  { %1715 = vmatpush.msk.msra.mxu2 %vm43_vm0, %v1910_v0 }
  0xd1   :  { %v491_v61 = vpop.f32.mrf.mxu1 }
  0xd2   :  { %666 = vmatpush.msra.mxu2 %v1920_v2 }
  0xd4   :  { %667 = vmatpush.msra.mxu2 %v1934_v4 }
  0xd5   :  { %1674 = vmatmul.msk.f32.gmra.mxu2 %vm30_vm1, %v2088_v31 }
  0xd6   :  { %668 = vmatpush.msra.mxu2 %v1948_v6 }
  0xdd   :  { %1693 = vmatmul.msk.f32.vlgmr.msrb.gmra.mxu2 %vm30_vm1, %v2132_v47 }
  0xe5   :  { %1694 = vmatmul.msk.f32.gmra.mxu2 %vm30_vm1, %v2149_v49 }
  0xed   :  { %1695 = vmatmul.msk.f32.gmra.mxu2 %vm30_vm1, %v2165_v50 }
  0xf5   :  { %1696 = vmatmul.msk.f32.gmra.mxu2 %vm30_vm1, %v2176_v51 }
  0xfd   :  { %1716 = vmatmul.msk.f32.vlgmr.msra.gmra.mxu2 %vm30_vm1, %v2224_v15 }
 0x105   :  { %1717 = vmatmul.msk.f32.gmra.mxu2 %vm30_vm1, %v2236_v17 }
 0x10d   :  { %1718 = vmatmul.msk.f32.gmra.mxu2 %vm30_vm1, %v2248_v18 }
 0x115   :  { %1719 = vmatmul.msk.f32.gmra.mxu2 %vm30_vm1, %v2264_v19 }
 0x120   :  { %v2102_v34 = vpop.f32.mrf.mxu2 }
 0x128   :  { %v2104_v36 = vpop.f32.mrf.mxu2 }
 0x12a   :  { %v2190_v52 = vpop.f32.mrf.mxu3 }
 0x130   :  { %v207_v38 = vpop.f32.mrf.mxu2 }
 0x132   :  { %v2192_v53 = vpop.f32.mrf.mxu3 }
 0x138   :  { %v210_v40 = vpop.f32.mrf.mxu2 }
 0x140   :  { %v213_v42 = vpop.f32.mrf.mxu2 }
 0x148   :  { %v216_v44 = vpop.f32.mrf.mxu2 }
 0x149   :  { %1652 = vmatpush.msk.msra.mxu3 %vm43_vm0, %v216_v44 }
 0x14b   :  { %244 = vmatpush.msra.mxu3 %v213_v42 }
 0x14d   :  { %245 = vmatpush.msra.mxu3 %v210_v40 }
 0x14f   :  { %246 = vmatpush.msra.mxu3 %v207_v38 }
 0x150   :  { %1653 = vmatmul.msk.f32.vlgmr.msra.gmra.mxu3 %vm30_vm1, %v2125_v45  ;;  %v2198_v59 = vpop.f32.mrf.mxu2 }
 0x151   :  { %1669 = vmatpush.msk.msrb.mxu3 %vm43_vm0, %v332_v46 }
 0x153   :  { %351 = vmatpush.msrb.mxu3 %v329_v43 }
 0x155   :  { %352 = vmatpush.msrb.mxu3 %v326_v41 }
 0x157   :  { %353 = vmatpush.msrb.mxu3 %v323_v39 }
 0x158   :  { %1654 = vmatmul.msk.f32.gmra.mxu3 %vm30_vm1, %v2142_v48  ;;  %v2205_v63 = vpop.f32.mrf.mxu2 }
 0x159   :  { %1675 = vmatpush.msk.msra.mxu3 %vm43_vm0, %v2023_v21 }
 0x15b   :  { %400 = vmatpush.msra.mxu3 %v2035_v23 }
 0x15d   :  { %401 = vmatpush.msra.mxu3 %v2046_v25 }
 0x15f   :  { %402 = vmatpush.msra.mxu3 %v2053_v26 }
 0x160   :  { %1670 = vmatmul.msk.f32.vlgmr.msrb.gmra.mxu3 %vm30_vm1, %v2018_v20  ;;  %v511_v9 = vpop.f32.mrf.mxu2 }
 0x161   :  { %1700 = vmatpush.msk.msrb.mxu3 %vm43_vm0, %v491_v61 }
 0x163   :  { %565 = vmatpush.msrb.mxu3 %v488_v58 }
 0x165   :  { %566 = vmatpush.msrb.mxu3 %v485_v56  ;;  %v2352_v56 = vld [vmem:[%s2660_s2 + $0x98] sm:$0x3f] }
 0x167   :  { %567 = vmatpush.msrb.mxu3 %v482_v54  ;;  %v2341_v54 = vld [vmem:[%s2660_s2 + $0x90] sm:$0xff] }
 0x168   :  { %1671 = vmatmul.msk.f32.gmra.mxu3 %vm30_vm1, %v2058_v27  ;;  %v514_v11 = vpop.f32.mrf.mxu2 }
 0x170   :  { %1676 = vmatmul.msk.f32.vlgmr.msra.gmra.mxu3 %vm30_vm1, %v2008_v16  ;;  %v517_v13 = vpop.f32.mrf.mxu2 }
 0x171   :  { %1720 = vmatpush.msk.msra.mxu3 %vm43_vm0, %v1915_v1 }
 0x173   :  { %695 = vmatpush.msra.mxu3 %v1929_v3 }
 0x175   :  { %696 = vmatpush.msra.mxu3 %v1939_v5 }
 0x177   :  { %697 = vmatpush.msra.mxu3 %v1953_v7 }
 0x178   :  { %1677 = vmatmul.msk.f32.gmra.mxu3 %vm30_vm1, %v2028_v22  ;;  %v520_v16 = vpop.f32.mrf.mxu2 }
 0x180   :  { %1678 = vmatmul.msk.f32.gmra.mxu3 %vm30_vm1, %v2070_v29  ;;  %v670_v24 = vpop.f32.mrf.mxu2 }
 0x188   :  { %1679 = vmatmul.msk.f32.gmra.mxu3 %vm30_vm1, %v2083_v30  ;;  %v673_v30 = vpop.f32.mrf.mxu2 }
 0x190   :  { %1701 = vmatmul.msk.f32.vlgmr.msrb.gmra.mxu3 %vm30_vm1, %v2064_v28  ;;  %v676_v35 = vpop.f32.mrf.mxu2 }
 0x191   :  { %1743 = vmatpush.msk.msrb.mxu3 %vm43_vm0, %v1910_v0 }
 0x193   :  { %854 = vmatpush.msrb.mxu3 %v1920_v2 }
 0x195   :  { %855 = vmatpush.msrb.mxu3 %v1934_v4 }
 0x197   :  { %856 = vmatpush.msrb.mxu3 %v1948_v6 }
 0x198   :  { %1702 = vmatmul.msk.f32.gmra.mxu3 %vm30_vm1, %v2088_v31  ;;  %v679_v39 = vpop.f32.mrf.mxu2 }
 0x1a0   :  { %1721 = vmatmul.msk.f32.vlgmr.msra.gmra.mxu3 %vm30_vm1, %v2224_v15 }
 0x1a8   :  { %1722 = vmatmul.msk.f32.gmra.mxu3 %vm30_vm1, %v2236_v17 }
 0x1b0   :  { %1723 = vmatmul.msk.f32.gmra.mxu3 %vm30_vm1, %v2248_v18 }
 0x1b8   :  { %1724 = vmatmul.msk.f32.gmra.mxu3 %vm30_vm1, %v2264_v19 }
 0x1d3   :  { %v2194_v55 = vpop.f32.mrf.mxu3 }
 0x1db   :  { %v2196_v57 = vpop.f32.mrf.mxu3 }
 0x1e3   :  { %v2200_v60 = vpop.f32.mrf.mxu3 }
 0x1eb   :  { %v2203_v62 = vpop.f32.mrf.mxu3 }
 0x1f3   :  { %v404_v8 = vpop.f32.mrf.mxu3 }
 0x1fb   :  { %v407_v10 = vpop.f32.mrf.mxu3 }
 0x203   :  { %v410_v12 = vpop.f32.mrf.mxu3 }
 0x20b   :  { %v413_v14 = vpop.f32.mrf.mxu3 }
 0x20c   :  { %1680 = vmatpush.msk.msra.mxu0 %vm43_vm0, %v413_v14 }
 0x20e   :  { %432 = vmatpush.msra.mxu0 %v410_v12 }
 0x210   :  { %433 = vmatpush.msra.mxu0 %v407_v10 }
 0x212   :  { %434 = vmatpush.msra.mxu0 %v404_v8 }
 0x213   :  { %1681 = vmatmul.msk.f32.vlgmr.msra.gmra.mxu0 %vm30_vm1, %v2125_v45  ;;  %v2284_v32 = vpop.f32.mrf.mxu3 }
 0x214   :  { %1697 = vmatpush.msk.msrb.mxu0 %vm43_vm0, %v520_v16 }
 0x216   :  { %539 = vmatpush.msrb.mxu0 %v517_v13 }
 0x218   :  { %540 = vmatpush.msrb.mxu0 %v514_v11 }
 0x21a   :  { %541 = vmatpush.msrb.mxu0 %v511_v9 }
 0x21b   :  { %1682 = vmatmul.msk.f32.gmra.mxu0 %vm30_vm1, %v2142_v48  ;;  %v2290_v38 = vpop.f32.mrf.mxu3 }
 0x21c   :  { %1703 = vmatpush.msk.msra.mxu0 %vm43_vm0, %v2023_v21 }
 0x21e   :  { %588 = vmatpush.msra.mxu0 %v2035_v23 }
 0x220   :  { %589 = vmatpush.msra.mxu0 %v2046_v25 }
 0x222   :  { %590 = vmatpush.msra.mxu0 %v2053_v26 }
 0x223   :  { %1698 = vmatmul.msk.f32.vlgmr.msrb.gmra.mxu0 %vm30_vm1, %v2018_v20  ;;  %v699_v41 = vpop.f32.mrf.mxu3 }
 0x224   :  { %1728 = vmatpush.msk.msrb.mxu0 %vm43_vm0, %v679_v39 }
 0x226   :  { %753 = vmatpush.msrb.mxu0 %v676_v35 }
 0x228   :  { %754 = vmatpush.msrb.mxu0 %v673_v30 }
 0x22a   :  { %755 = vmatpush.msrb.mxu0 %v670_v24 }
 0x22b   :  { %1699 = vmatmul.msk.f32.gmra.mxu0 %vm30_vm1, %v2058_v27  ;;  %v702_v43 = vpop.f32.mrf.mxu3 }
 0x233   :  { %1704 = vmatmul.msk.f32.vlgmr.msra.gmra.mxu0 %vm30_vm1, %v2132_v47  ;;  %v705_v46 = vpop.f32.mrf.mxu3 }
 0x234   :  { %1748 = vmatpush.msk.msra.mxu0 %vm43_vm0, %v1915_v1 }
 0x236   :  { %883 = vmatpush.msra.mxu0 %v1929_v3 }
 0x238   :  { %884 = vmatpush.msra.mxu0 %v1939_v5 }
 0x23a   :  { %885 = vmatpush.msra.mxu0 %v1953_v7 }
 0x23b   :  { %1705 = vmatmul.msk.f32.gmra.mxu0 %vm30_vm1, %v2149_v49  ;;  %v708_v49 = vpop.f32.mrf.mxu3 }
 0x243   :  { %1706 = vmatmul.msk.f32.gmra.mxu0 %vm30_vm1, %v2165_v50  ;;  %v2313_v50 = vld [vmem:[%s2660_s2 + $0x80] sm:$0xff] }
 0x244   :  { %1744 = vmatmul.msk.f32.vlgmr.msrb.gmra.mxu3 %vm30_vm1, %v2313_v50 }
 0x24b   :  { %1707 = vmatmul.msk.f32.gmra.mxu0 %vm30_vm1, %v2176_v51  ;;  %v2325_v51 = vld [vmem:[%s2660_s2 + $0x88] sm:$0xff] }
 0x24c   :  { %1745 = vmatmul.msk.f32.gmra.mxu3 %vm30_vm1, %v2325_v51 }
 0x253   :  { %1729 = vmatmul.msk.f32.vlgmr.msrb.gmra.mxu0 %vm30_vm1, %v2064_v28 }
 0x254   :  { %1771 = vmatpush.msk.msrb.mxu0 %vm43_vm0, %v1910_v0  ;;  %1746 = vmatmul.msk.f32.gmra.mxu3 %vm30_vm1, %v2341_v54 }
 0x256   :  { %1042 = vmatpush.msrb.mxu0 %v1920_v2 }
 0x258   :  { %1043 = vmatpush.msrb.mxu0 %v1934_v4 }
 0x25a   :  { %1044 = vmatpush.msrb.mxu0 %v1948_v6 }
 0x25b   :  { %1730 = vmatmul.msk.f32.gmra.mxu0 %vm30_vm1, %v2088_v31 }
 0x25c   :  { %1747 = vmatmul.msk.f32.gmra.mxu3 %vm30_vm1, %v2352_v56 }
 0x263   :  { %1749 = vmatmul.msk.f32.vlgmr.msra.gmra.mxu0 %vm30_vm1, %v2313_v50 }
 0x26b   :  { %1750 = vmatmul.msk.f32.gmra.mxu0 %vm30_vm1, %v2325_v51 }
 0x273   :  { %1751 = vmatmul.msk.f32.gmra.mxu0 %vm30_vm1, %v2341_v54 }
 0x27b   :  { %1752 = vmatmul.msk.f32.gmra.mxu0 %vm30_vm1, %v2352_v56 }
 0x290   :  { %v2280_v22 = vpop.f32.mrf.mxu0 }
 0x298   :  { %v2282_v29 = vpop.f32.mrf.mxu0 }
 0x2a0   :  { %v2286_v33 = vpop.f32.mrf.mxu0 }
 0x2a8   :  { %v2288_v37 = vpop.f32.mrf.mxu0 }
 0x2b0   :  { %v592_v40 = vpop.f32.mrf.mxu0 }
 0x2b8   :  { %v595_v42 = vpop.f32.mrf.mxu0 }
 0x2c0   :  { %v598_v44 = vpop.f32.mrf.mxu0 }
 0x2c7   :  { %v858_v8 = vpop.f32.mrf.mxu3 }
 0x2c8   :  { %v601_v47 = vpop.f32.mrf.mxu0 }
 0x2c9   :  { %1708 = vmatpush.msk.msrb.mxu1 %vm43_vm0, %v601_v47  ;;  %v382_v47 = vadd.f32 %v2198_v59, %v2200_v60  ;;  %v180_v59 = vadd.f32 %v2192_v53, %v2104_v36 }
 0x2cb   :  { %620 = vmatpush.msrb.mxu1 %v598_v44  ;;  %v2425_v44 = vld [vmem:[%s2660_s2 + $0xb0] sm:$0xff] }
 0x2cd   :  { %621 = vmatpush.msrb.mxu1 %v595_v42  ;;  %v2398_v42 = vld [vmem:[%s2660_s2 + $0xa0] sm:$0xff] }
 0x2ce   :  { %1772 = vmatmul.msk.f32.vlgmr.msrb.gmra.mxu0 %vm30_vm1, %v2398_v42 }
 0x2cf   :  { %622 = vmatpush.msrb.mxu1 %v592_v40  ;;  %v861_v11 = vpop.f32.mrf.mxu3 }
 0x2d0   :  { %1709 = vmatmul.msk.f32.vlgmr.msrb.gmra.mxu1 %vm30_vm1, %v2125_v45  ;;  %v757_v9 = vpop.f32.mrf.mxu0 }
 0x2d1   :  { %1725 = vmatpush.msk.msra.mxu1 %vm43_vm0, %v708_v49  ;;  %v177_v49 = vadd.f32 %v2190_v52, %v2102_v34 }
 0x2d3   :  { %727 = vmatpush.msra.mxu1 %v705_v46  ;;  %v2434_v46 = vld [vmem:[%s2660_s2 + $0xb8] sm:$0x3f] }
 0x2d5   :  { %728 = vmatpush.msra.mxu1 %v702_v43  ;;  %v2414_v43 = vld [vmem:[%s2660_s2 + $0xa8] sm:$0xff] }
 0x2d6   :  { %1773 = vmatmul.msk.f32.gmra.mxu0 %vm30_vm1, %v2414_v43 }
 0x2d7   :  { %729 = vmatpush.msra.mxu1 %v699_v41 }
 0x2d8   :  { %1710 = vmatmul.msk.f32.gmra.mxu1 %vm30_vm1, %v2142_v48  ;;  %v760_v13 = vpop.f32.mrf.mxu0 }
 0x2d9   :  { %1731 = vmatpush.msk.msrb.mxu1 %vm43_vm0, %v2023_v21 }
 0x2db   :  { %776 = vmatpush.msrb.mxu1 %v2035_v23 }
 0x2dd   :  { %777 = vmatpush.msrb.mxu1 %v2046_v25 }
 0x2de   :  { %1774 = vmatmul.msk.f32.gmra.mxu0 %vm30_vm1, %v2425_v44 }
 0x2df   :  { %778 = vmatpush.msrb.mxu1 %v2053_v26 }
 0x2e0   :  { %1726 = vmatmul.msk.f32.vlgmr.msra.gmra.mxu1 %vm30_vm1, %v2018_v20 }
 0x2e6   :  { %1775 = vmatmul.msk.f32.gmra.mxu0 %vm30_vm1, %v2434_v46 }
 0x2e8   :  { %1727 = vmatmul.msk.f32.gmra.mxu1 %vm30_vm1, %v2058_v27 }
 0x2f0   :  { %1732 = vmatmul.msk.f32.vlgmr.msrb.gmra.mxu1 %vm30_vm1, %v2224_v15  ;;  %v864_v15 = vpop.f32.mrf.mxu3 }
 0x2f8   :  { %1733 = vmatmul.msk.f32.gmra.mxu1 %vm30_vm1, %v2236_v17  ;;  %v887_v17 = vpop.f32.mrf.mxu0  ;;  %v867_v24 = vpop.f32.mrf.mxu3 }
 0x2f9   :  { %1756 = vmatpush.msk.msra.mxu1 %vm43_vm0, %v867_v24 }
 0x2fb   :  { %941 = vmatpush.msra.mxu1 %v864_v15 }
 0x2fd   :  { %942 = vmatpush.msra.mxu1 %v861_v11 }
 0x2ff   :  { %943 = vmatpush.msra.mxu1 %v858_v8  ;;  %v570_v8 = vadd.f32 %v2284_v32, %v2286_v33  ;;  %v255_v32 = vadd.f32 %v2196_v57, %v180_v59 }
 0x300   :  { %1734 = vmatmul.msk.f32.gmra.mxu1 %vm30_vm1, %v2248_v18  ;;  %v890_v30 = vpop.f32.mrf.mxu0 }
 0x301   :  { %1776 = vmatpush.msk.msrb.mxu1 %vm43_vm0, %v1915_v1  ;;  %v257_v36 = vand.u32 2147483647, %v255_v32 }
 0x303   :  { %1071 = vmatpush.msrb.mxu1 %v1929_v3 }
 0x305   :  { %1072 = vmatpush.msrb.mxu1 %v1939_v5 }
 0x307   :  { %1073 = vmatpush.msrb.mxu1 %v1953_v7 }
 0x308   :  { %1735 = vmatmul.msk.f32.gmra.mxu1 %vm30_vm1, %v2264_v19  ;;  %v893_v39 = vpop.f32.mrf.mxu0 }
 0x310   :  { %1757 = vmatmul.msk.f32.vlgmr.msra.gmra.mxu1 %vm30_vm1, %v2064_v28  ;;  %v896_v41 = vpop.f32.mrf.mxu0 }
 0x311   :  { %1799 = vmatpush.msk.msra.mxu1 %vm43_vm0, %v1910_v0 }
 0x313   :  { %1230 = vmatpush.msra.mxu1 %v1920_v2 }
 0x315   :  { %1231 = vmatpush.msra.mxu1 %v1934_v4 }
 0x317   :  { %1232 = vmatpush.msra.mxu1 %v1948_v6 }
 0x318   :  { %1758 = vmatmul.msk.f32.gmra.mxu1 %vm30_vm1, %v2088_v31 }
 0x320   :  { %1777 = vmatmul.msk.f32.vlgmr.msrb.gmra.mxu1 %vm30_vm1, %v2398_v42 }
 0x328   :  { %1778 = vmatmul.msk.f32.gmra.mxu1 %vm30_vm1, %v2414_v43 }
 0x330   :  { %1779 = vmatmul.msk.f32.gmra.mxu1 %vm30_vm1, %v2425_v44 }
 0x338   :  { %1780 = vmatmul.msk.f32.gmra.mxu1 %vm30_vm1, %v2434_v46 }
 0x34d   :  { %v2366_v58 = vpop.f32.mrf.mxu1 }
 0x355   :  { %v2368_v61 = vpop.f32.mrf.mxu1 }
 0x35d   :  { %v731_v10 = vpop.f32.mrf.mxu1 }
 0x35e   :  { %v2370_v12 = vadd.f32 %v757_v9, %v731_v10  ;;  %v254_v9 = vadd.f32 %v2194_v55, %v177_v49 }
 0x365   :  { %v734_v14 = vpop.f32.mrf.mxu1 }
 0x366   :  { %v2372_v16 = vadd.f32 %v760_v13, %v734_v14 }
 0x36d   :  { %v780_v18 = vpop.f32.mrf.mxu1 }
 0x375   :  { %v783_v19 = vpop.f32.mrf.mxu1 }
 0x37d   :  { %v786_v35 = vpop.f32.mrf.mxu1 }
 0x385   :  { %v789_v40 = vpop.f32.mrf.mxu1 }
 0x386   :  { %1736 = vmatpush.msk.msrb.mxu2 %vm43_vm0, %v789_v40 }
 0x388   :  { %808 = vmatpush.msrb.mxu2 %v786_v35 }
 0x38a   :  { %809 = vmatpush.msrb.mxu2 %v783_v19 }
 0x38c   :  { %810 = vmatpush.msrb.mxu2 %v780_v18 }
 0x38d   :  { %1737 = vmatmul.msk.f32.vlgmr.msrb.gmra.mxu2 %vm30_vm1, %v2125_v45 }
 0x38e   :  { %1753 = vmatpush.msk.msra.mxu2 %vm43_vm0, %v896_v41 }
 0x390   :  { %915 = vmatpush.msra.mxu2 %v893_v39 }
 0x392   :  { %916 = vmatpush.msra.mxu2 %v890_v30 }
 0x394   :  { %917 = vmatpush.msra.mxu2 %v887_v17 }
 0x395   :  { %1738 = vmatmul.msk.f32.gmra.mxu2 %vm30_vm1, %v2142_v48 }
 0x396   :  { %1759 = vmatpush.msk.msrb.mxu2 %vm43_vm0, %v2023_v21 }
 0x398   :  { %964 = vmatpush.msrb.mxu2 %v2035_v23 }
 0x39a   :  { %965 = vmatpush.msrb.mxu2 %v2046_v25 }
 0x39c   :  { %966 = vmatpush.msrb.mxu2 %v2053_v26 }
 0x39d   :  { %1754 = vmatmul.msk.f32.vlgmr.msra.gmra.mxu2 %vm30_vm1, %v2018_v20 }
 0x3a5   :  { %1755 = vmatmul.msk.f32.gmra.mxu2 %vm30_vm1, %v2058_v27 }
 0x3ad   :  { %1760 = vmatmul.msk.f32.vlgmr.msrb.gmra.mxu2 %vm30_vm1, %v2313_v50  ;;  %v442_v50 = vadd.f32 %v2280_v22, %v382_v47  ;;  %v573_v22 = vadd.f32 %v2290_v38, %v2288_v37 }
 0x3af   :  { %v444_v10 = vand.u32 2147483647, %v442_v50 }
 0x3b5   :  { %1761 = vmatmul.msk.f32.gmra.mxu2 %vm30_vm1, %v2325_v51  ;;  %v630_v51 = vadd.f32 %v2366_v58, %v570_v8  ;;  %v631_v58 = vadd.f32 %v2368_v61, %v573_v22 }
 0x3b7   :  { %v632_v11 = vand.u32 2147483647, %v630_v51  ;;  %v633_v53 = vand.u32 2147483647, %v631_v58 }
 0x3bd   :  { %1762 = vmatmul.msk.f32.gmra.mxu2 %vm30_vm1, %v2341_v54  ;;  %v256_v54 = vand.u32 2147483647, %v254_v9 }
 0x3bf   :  { %v446_v34 = vadd.f32 %v444_v10, %v256_v54 }
 0x3c1   :  { %v634_v33 = vadd.f32 %v632_v11, %v446_v34 }
 0x3c5   :  { %1763 = vmatmul.msk.f32.gmra.mxu2 %vm30_vm1, %v2352_v56  ;;  %v385_v56 = vadd.f32 %v2205_v63, %v2203_v62  ;;  %v1046_v62 = vpop.f32.mrf.mxu0 }
 0x3c7   :  { %v443_v52 = vadd.f32 %v2282_v29, %v385_v56 }
 0x3c9   :  { %v445_v63 = vand.u32 2147483647, %v443_v52 }
 0x3cb   :  { %v447_v17 = vadd.f32 %v445_v63, %v257_v36 }
 0x3cd   :  { %v635_v18 = vadd.f32 %v633_v53, %v447_v17  ;;  %v1049_v38 = vpop.f32.mrf.mxu0 }
 0x3d5   :  { %v1052_v61 = vpop.f32.mrf.mxu0 }
 0x3dd   :  { %v1055_v40 = vpop.f32.mrf.mxu0 }
 0x3de   :  { %1784 = vmatpush.msk.msra.mxu2 %vm43_vm0, %v1055_v40 }
 0x3e0   :  { %1129 = vmatpush.msra.mxu2 %v1052_v61 }
 0x3e2   :  { %1130 = vmatpush.msra.mxu2 %v1049_v38 }
 0x3e4   :  { %1131 = vmatpush.msra.mxu2 %v1046_v62 }
 0x3e5   :  { %1785 = vmatmul.msk.f32.vlgmr.msra.gmra.mxu2 %vm30_vm1, %v2064_v28 }
 0x3e6   :  { %1804 = vmatpush.msk.msrb.mxu2 %vm43_vm0, %v1915_v1 }
 0x3e8   :  { %1259 = vmatpush.msrb.mxu2 %v1929_v3 }
 0x3ea   :  { %1260 = vmatpush.msrb.mxu2 %v1939_v5 }
 0x3ec   :  { %1261 = vmatpush.msrb.mxu2 %v1953_v7 }
 0x3ed   :  { %1786 = vmatmul.msk.f32.gmra.mxu2 %vm30_vm1, %v2088_v31 }
 0x3ee   :  { %1827 = vmatpush.msk.msra.mxu2 %vm43_vm0, %v1910_v0  ;;  %v2495_v0 = vld [vmem:[%s2660_s2 + $0xc0] sm:$0xff] }
 0x3ef   :  { %1800 = vmatmul.msk.f32.vlgmr.msra.gmra.mxu1 %vm30_vm1, %v2495_v0 }
 0x3f0   :  { %1418 = vmatpush.msra.mxu2 %v1920_v2  ;;  %v2507_v2 = vld [vmem:[%s2660_s2 + $0xc8] sm:$0xff] }
 0x3f2   :  { %1419 = vmatpush.msra.mxu2 %v1934_v4  ;;  %v2523_v4 = vld [vmem:[%s2660_s2 + $0xd0] sm:$0xff] }
 0x3f4   :  { %1420 = vmatpush.msra.mxu2 %v1948_v6  ;;  %v2534_v6 = vld [vmem:[%s2660_s2 + $0xd8] sm:$0x3f] }
 0x3f5   :  { %1805 = vmatmul.msk.f32.vlgmr.msrb.gmra.mxu2 %vm30_vm1, %v2495_v0 }
 0x3f7   :  { %1801 = vmatmul.msk.f32.gmra.mxu1 %vm30_vm1, %v2507_v2 }
 0x3fd   :  { %1806 = vmatmul.msk.f32.gmra.mxu2 %vm30_vm1, %v2507_v2 }
 0x3ff   :  { %1802 = vmatmul.msk.f32.gmra.mxu1 %vm30_vm1, %v2523_v4 }
 0x405   :  { %1807 = vmatmul.msk.f32.gmra.mxu2 %vm30_vm1, %v2523_v4 }
 0x407   :  { %1803 = vmatmul.msk.f32.gmra.mxu1 %vm30_vm1, %v2534_v6 }
 0x40d   :  { %1808 = vmatmul.msk.f32.gmra.mxu2 %vm30_vm1, %v2534_v6 }
 0x410   :  { %v812_v60 = vpop.f32.mrf.mxu2 }
 0x411   :  { %v818_v55 = vadd.f32 %v812_v60, %v2370_v12  ;;  %v945_v12 = vpop.f32.mrf.mxu1 }
 0x413   :  { %v820_v13 = vand.u32 2147483647, %v818_v55 }
 0x415   :  { %v2467_v14 = vadd.f32 %v820_v13, %v634_v33 }
 0x418   :  { %v815_v15 = vpop.f32.mrf.mxu2 }
 0x419   :  { %v819_v29 = vadd.f32 %v815_v15, %v2372_v16  ;;  %v948_v30 = vpop.f32.mrf.mxu1 }
 0x41b   :  { %v821_v37 = vand.u32 2147483647, %v819_v29  ;;  %v1826_v29 = vld [vmem:[%s2660_s2 + $0xf8] sm:$0x3f] }
 0x41d   :  { %v2470_v24 = vadd.f32 %v821_v37, %v635_v18 }
 0x420   :  { %v919_v57 = vpop.f32.mrf.mxu2 }
 0x421   :  { %v946_v19 = vadd.f32 %v945_v12, %v919_v57  ;;  %v1075_v47 = vpop.f32.mrf.mxu1 }
 0x428   :  { %v922_v35 = vpop.f32.mrf.mxu2 }
 0x429   :  { %v2472_v39 = vadd.f32 %v948_v30, %v922_v35  ;;  %v1078_v49 = vpop.f32.mrf.mxu1 }
 0x430   :  { %v968_v41 = vpop.f32.mrf.mxu2 }
 0x431   :  { %v1081_v8 = vpop.f32.mrf.mxu1 }
 0x438   :  { %v971_v16 = vpop.f32.mrf.mxu2 }
 0x439   :  { %v1084_v51 = vpop.f32.mrf.mxu1 }
 0x440   :  { %v974_v50 = vpop.f32.mrf.mxu2 }
 0x448   :  { %v977_v9 = vpop.f32.mrf.mxu2 }
 0x449   :  { %1764 = vmatpush.msk.msra.mxu3 %vm43_vm0, %v977_v9 }
 0x44b   :  { %996 = vmatpush.msra.mxu3 %v974_v50 }
 0x44d   :  { %997 = vmatpush.msra.mxu3 %v971_v16 }
 0x44f   :  { %998 = vmatpush.msra.mxu3 %v968_v41 }
 0x450   :  { %1765 = vmatmul.msk.f32.vlgmr.msra.gmra.mxu3 %vm30_vm1, %v2125_v45 }
 0x451   :  { %1781 = vmatpush.msk.msrb.mxu3 %vm43_vm0, %v1084_v51 }
 0x453   :  { %1103 = vmatpush.msrb.mxu3 %v1081_v8 }
 0x455   :  { %1104 = vmatpush.msrb.mxu3 %v1078_v49 }
 0x457   :  { %1105 = vmatpush.msrb.mxu3 %v1075_v47 }
 0x458   :  { %1766 = vmatmul.msk.f32.gmra.mxu3 %vm30_vm1, %v2142_v48 }
 0x459   :  { %1787 = vmatpush.msk.msra.mxu3 %vm43_vm0, %v2023_v21 }
 0x45b   :  { %1152 = vmatpush.msra.mxu3 %v2035_v23 }
 0x45d   :  { %1153 = vmatpush.msra.mxu3 %v2046_v25 }
 0x45f   :  { %1154 = vmatpush.msra.mxu3 %v2053_v26 }
 0x460   :  { %1782 = vmatmul.msk.f32.vlgmr.msrb.gmra.mxu3 %vm30_vm1, %v2018_v20 }
 0x468   :  { %1783 = vmatmul.msk.f32.gmra.mxu3 %vm30_vm1, %v2058_v27 }
 0x46c   :  { %v1234_v10 = vpop.f32.mrf.mxu1 }
 0x470   :  { %1788 = vmatmul.msk.f32.vlgmr.msra.gmra.mxu3 %vm30_vm1, %v2398_v42 }
 0x474   :  { %v1237_v59 = vpop.f32.mrf.mxu1 }
 0x478   :  { %1789 = vmatmul.msk.f32.gmra.mxu3 %vm30_vm1, %v2414_v43  ;;  %v1133_v43 = vpop.f32.mrf.mxu2 }
 0x47c   :  { %v1240_v22 = vpop.f32.mrf.mxu1 }
 0x480   :  { %1790 = vmatmul.msk.f32.gmra.mxu3 %vm30_vm1, %v2425_v44  ;;  %v1136_v33 = vpop.f32.mrf.mxu2 }
 0x488   :  { %1791 = vmatmul.msk.f32.gmra.mxu3 %vm30_vm1, %v2434_v46  ;;  %v1243_v46 = vpop.f32.mrf.mxu1  ;;  %v1263_v63 = vpop.f32.mrf.mxu2 }
 0x489   :  { %1812 = vmatpush.msk.msrb.mxu3 %vm43_vm0, %v1243_v46 }
 0x48b   :  { %1317 = vmatpush.msrb.mxu3 %v1240_v22 }
 0x48d   :  { %1318 = vmatpush.msrb.mxu3 %v1237_v59 }
 0x48f   :  { %1319 = vmatpush.msrb.mxu3 %v1234_v10 }
 0x490   :  { %1813 = vmatmul.msk.f32.vlgmr.msrb.gmra.mxu3 %vm30_vm1, %v2064_v28  ;;  %v1266_v36 = vpop.f32.mrf.mxu2 }
 0x491   :  { %1832 = vmatpush.msk.msra.mxu3 %vm43_vm0, %v1915_v1 }
 0x493   :  { %1447 = vmatpush.msra.mxu3 %v1929_v3  ;;  %v2571_v3 = vld [vmem:[%s2660_s2 + $0xe0] sm:$0xff] }
 0x494   :  { %1828 = vmatmul.msk.f32.vlgmr.msra.gmra.mxu2 %vm30_vm1, %v2571_v3 }
 0x495   :  { %1448 = vmatpush.msra.mxu3 %v1939_v5  ;;  %v2583_v5 = vld [vmem:[%s2660_s2 + $0xe8] sm:$0xff] }
 0x497   :  { %1449 = vmatpush.msra.mxu3 %v1953_v7  ;;  %v1825_v7 = vld [vmem:[%s2660_s2 + $0xf0] sm:$0xff]  ;;  %s1886_s2 = smov [#allocation3]  }
 0x498   :  { %1814 = vmatmul.msk.f32.gmra.mxu3 %vm30_vm1, %v2088_v31  ;;  %v1269_v15 = vpop.f32.mrf.mxu2  ;;  %s1608_s27 = sshll.u32 %s1886_s2, 4  ;;  %s1609_s27 = int_to_ptr.vmem [resolvable:$true] %s1608_s27 }
 0x49c   :  { %1829 = vmatmul.msk.f32.gmra.mxu2 %vm30_vm1, %v2583_v5 }
 0x4a0   :  { %v1272_v1 = vpop.f32.mrf.mxu2  ;;  %1833 = vmatmul.msk.f32.vlgmr.msra.gmra.mxu3 %vm30_vm1, %v2571_v3 }
 0x4a4   :  { %1830 = vmatmul.msk.f32.gmra.mxu2 %vm30_vm1, %v1825_v7 }
 0x4a8   :  { %1834 = vmatmul.msk.f32.gmra.mxu3 %vm30_vm1, %v2583_v5 }
 0x4ac   :  { %1831 = vmatmul.msk.f32.gmra.mxu2 %vm30_vm1, %v1826_v29 }
 0x4b0   :  { %1835 = vmatmul.msk.f32.gmra.mxu3 %vm30_vm1, %v1825_v7 }
 0x4b8   :  { %1836 = vmatmul.msk.f32.gmra.mxu3 %vm30_vm1, %v1826_v29 }
 0x4d3   :  { %v1000_v54 = vpop.f32.mrf.mxu3 }
 0x4d4   :  { %v1006_v56 = vadd.f32 %v1000_v54, %v946_v19 }
 0x4d6   :  { %v1008_v11 = vand.u32 2147483647, %v1006_v56 }
 0x4d8   :  { %v2549_v60 = vadd.f32 %v1008_v11, %v2467_v14 }
 0x4db   :  { %v1003_v34 = vpop.f32.mrf.mxu3 }
 0x4dc   :  { %v1007_v42 = vadd.f32 %v1003_v34, %v2472_v39  ;;  %v1885_v34 = vmov 0.0  }
 0x4dd   :  { %20 = vst.msk [vmem:[#allocation2] sm:$0xff] %vm19_vm2, %v1885_v34 }
 0x4de   :  { %v1009_v52 = vand.u32 2147483647, %v1007_v42  ;;  %21 = vst.msk [vmem:[#allocation2 + $0x8] sm:$0xff] %vm19_vm2, %v1885_v34 }
 0x4e0   :  { %v2553_v55 = vadd.f32 %v1009_v52, %v2470_v24 }
 0x4e3   :  { %v1107_v44 = vpop.f32.mrf.mxu3 }
 0x4e4   :  { %v1134_v32 = vadd.f32 %v1133_v43, %v1107_v44 }
 0x4eb   :  { %v1110_v58 = vpop.f32.mrf.mxu3 }
 0x4ec   :  { %v1137_v13 = vadd.f32 %v1136_v33, %v1110_v58  ;;  %v1576_v33 = vld [vmem:[#allocation2] sm:$0xff] }
 0x4f3   :  { %v1156_v62 = vpop.f32.mrf.mxu3 }
 0x4fb   :  { %v1159_v14 = vpop.f32.mrf.mxu3 }
 0x503   :  { %v1162_v53 = vpop.f32.mrf.mxu3 }
 0x50b   :  { %v1165_v17 = vpop.f32.mrf.mxu3 }
 0x50c   :  { %1792 = vmatpush.msk.msra.mxu0 %vm43_vm0, %v1165_v17 }
 0x50e   :  { %1184 = vmatpush.msra.mxu0 %v1162_v53  ;;  %v1577_v53 = vld [vmem:[#allocation2 + $0x8] sm:$0xff] }
 0x510   :  { %1185 = vmatpush.msra.mxu0 %v1159_v14 }
 0x512   :  { %1186 = vmatpush.msra.mxu0 %v1156_v62 }
 0x513   :  { %1793 = vmatmul.msk.f32.vlgmr.msra.gmra.mxu0 %vm30_vm1, %v2125_v45  ;;  %v1321_v61 = vpop.f32.mrf.mxu3 }
 0x514   :  { %1809 = vmatpush.msk.msrb.mxu0 %vm43_vm0, %v1272_v1 }
 0x516   :  { %1291 = vmatpush.msrb.mxu0 %v1269_v15 }
 0x517   :  { %v1422_v39 = vpop.f32.mrf.mxu2 }
 0x518   :  { %1292 = vmatpush.msrb.mxu0 %v1266_v36 }
 0x51a   :  { %1293 = vmatpush.msrb.mxu0 %v1263_v63 }
 0x51b   :  { %1794 = vmatmul.msk.f32.gmra.mxu0 %vm30_vm1, %v2142_v48  ;;  %v1324_v41 = vpop.f32.mrf.mxu3 }
 0x51c   :  { %1815 = vmatpush.msk.msra.mxu0 %vm43_vm0, %v2023_v21 }
 0x51e   :  { %1340 = vmatpush.msra.mxu0 %v2035_v23 }
 0x51f   :  { %v1425_v16 = vpop.f32.mrf.mxu2 }
 0x520   :  { %1341 = vmatpush.msra.mxu0 %v2046_v25 }
 0x522   :  { %1342 = vmatpush.msra.mxu0 %v2053_v26 }
 0x523   :  { %1810 = vmatmul.msk.f32.vlgmr.msrb.gmra.mxu0 %vm30_vm1, %v2018_v20  ;;  %v1451_v50 = vpop.f32.mrf.mxu3 }
 0x527   :  { %v1428_v9 = vpop.f32.mrf.mxu2 }
 0x52b   :  { %1811 = vmatmul.msk.f32.gmra.mxu0 %vm30_vm1, %v2058_v27 }
 0x533   :  { %1816 = vmatmul.msk.f32.vlgmr.msra.gmra.mxu0 %vm30_vm1, %v2495_v0  ;;  %v1431_v0 = vpop.f32.mrf.mxu2 }
 0x534   :  { %1840 = vmatpush.msk.msrb.mxu0 %vm43_vm0, %v1431_v0 }
 0x536   :  { %1505 = vmatpush.msrb.mxu0 %v1428_v9 }
 0x538   :  { %1506 = vmatpush.msrb.mxu0 %v1425_v16 }
 0x53a   :  { %1507 = vmatpush.msrb.mxu0 %v1422_v39 }
 0x53b   :  { %1817 = vmatmul.msk.f32.gmra.mxu0 %vm30_vm1, %v2507_v2  ;;  %v1454_v2 = vpop.f32.mrf.mxu3 }
 0x543   :  { %1818 = vmatmul.msk.f32.gmra.mxu0 %vm30_vm1, %v2523_v4 }
 0x54b   :  { %1819 = vmatmul.msk.f32.gmra.mxu0 %vm30_vm1, %v2534_v6  ;;  %v1457_v6 = vpop.f32.mrf.mxu3 }
 0x553   :  { %1841 = vmatmul.msk.f32.vlgmr.msrb.gmra.mxu0 %vm30_vm1, %v2064_v28  ;;  %v1460_v54 = vpop.f32.mrf.mxu3 }
 0x55b   :  { %1842 = vmatmul.msk.f32.gmra.mxu0 %vm30_vm1, %v2088_v31 }
 0x590   :  { %v1188_v18 = vpop.f32.mrf.mxu0 }
 0x591   :  { %v1194_v37 = vadd.f32 %v1188_v18, %v1134_v32 }
 0x593   :  { %v1196_v38 = vand.u32 2147483647, %v1194_v37 }
 0x595   :  { %v1198_v12 = vadd.f32 %v1196_v38, %v2549_v60 }
 0x598   :  { %v1191_v24 = vpop.f32.mrf.mxu0 }
 0x599   :  { %v1195_v57 = vadd.f32 %v1191_v24, %v1137_v13 }
 0x59b   :  { %v1197_v19 = vand.u32 2147483647, %v1195_v57 }
 0x59d   :  { %v1199_v30 = vadd.f32 %v1197_v19, %v2553_v55 }
 0x5a0   :  { %v1295_v35 = vpop.f32.mrf.mxu0 }
 0x5a1   :  { %v1322_v40 = vadd.f32 %v1321_v61, %v1295_v35 }
 0x5a8   :  { %v1298_v47 = vpop.f32.mrf.mxu0 }
 0x5a9   :  { %v1325_v49 = vadd.f32 %v1324_v41, %v1298_v47 }
 0x5b0   :  { %v1344_v8 = vpop.f32.mrf.mxu0 }
 0x5b8   :  { %v1347_v51 = vpop.f32.mrf.mxu0 }
 0x5c0   :  { %v1350_v4 = vpop.f32.mrf.mxu0 }
 0x5c8   :  { %v1353_v10 = vpop.f32.mrf.mxu0 }
 0x5c9   :  { %1820 = vmatpush.msk.msrb.mxu1 %vm43_vm0, %v1353_v10 }
 0x5cb   :  { %1372 = vmatpush.msrb.mxu1 %v1350_v4 }
 0x5cd   :  { %1373 = vmatpush.msrb.mxu1 %v1347_v51 }
 0x5cf   :  { %1374 = vmatpush.msrb.mxu1 %v1344_v8 }
 0x5d0   :  { %1821 = vmatmul.msk.f32.vlgmr.msrb.gmra.mxu1 %vm30_vm1, %v2125_v45  ;;  %v1509_v22 = vpop.f32.mrf.mxu0 }
 0x5d1   :  { %1837 = vmatpush.msk.msra.mxu1 %vm43_vm0, %v1460_v54 }
 0x5d3   :  { %1479 = vmatpush.msra.mxu1 %v1457_v6 }
 0x5d5   :  { %1480 = vmatpush.msra.mxu1 %v1454_v2 }
 0x5d7   :  { %1481 = vmatpush.msra.mxu1 %v1451_v50 }
 0x5d8   :  { %1822 = vmatmul.msk.f32.gmra.mxu1 %vm30_vm1, %v2142_v48  ;;  %v1512_v46 = vpop.f32.mrf.mxu0 }
 0x5d9   :  { %1843 = vmatpush.msk.msrb.mxu1 %vm43_vm0, %v2023_v21 }
 0x5db   :  { %1528 = vmatpush.msrb.mxu1 %v2035_v23 }
 0x5dd   :  { %1529 = vmatpush.msrb.mxu1 %v2046_v25 }
 0x5df   :  { %1530 = vmatpush.msrb.mxu1 %v2053_v26 }
 0x5e0   :  { %1838 = vmatmul.msk.f32.vlgmr.msra.gmra.mxu1 %vm30_vm1, %v2018_v20 }
 0x5e8   :  { %1839 = vmatmul.msk.f32.gmra.mxu1 %vm30_vm1, %v2058_v27 }
 0x5f0   :  { %1844 = vmatmul.msk.f32.vlgmr.msrb.gmra.mxu1 %vm30_vm1, %v2571_v3 }
 0x5f8   :  { %1845 = vmatmul.msk.f32.gmra.mxu1 %vm30_vm1, %v2583_v5 }
 0x600   :  { %1846 = vmatmul.msk.f32.gmra.mxu1 %vm30_vm1, %v1825_v7 }
 0x608   :  { %1847 = vmatmul.msk.f32.gmra.mxu1 %vm30_vm1, %v1826_v29 }
 0x64d   :  { %v1376_v21 = vpop.f32.mrf.mxu1 }
 0x64e   :  { %v1382_v23 = vadd.f32 %v1376_v21, %v1322_v40 }
 0x650   :  { %v1384_v25 = vand.u32 2147483647, %v1382_v23 }
 0x652   :  { %v1386_v26 = vadd.f32 %v1384_v25, %v1198_v12 }
 0x655   :  { %v1379_v28 = vpop.f32.mrf.mxu1 }
 0x656   :  { %v1383_v31 = vadd.f32 %v1379_v28, %v1325_v49 }
 0x658   :  { %v1385_v20 = vand.u32 2147483647, %v1383_v31 }
 0x65a   :  { %v1387_v56 = vadd.f32 %v1385_v20, %v1199_v30 }
 0x65d   :  { %v1483_v11 = vpop.f32.mrf.mxu1 }
 0x65e   :  { %v1510_v43 = vadd.f32 %v1509_v22, %v1483_v11 }
 0x665   :  { %v1486_v27 = vpop.f32.mrf.mxu1 }
 0x666   :  { %v1513_v13 = vadd.f32 %v1512_v46, %v1486_v27 }
 0x66d   :  { %v1532_v59 = vpop.f32.mrf.mxu1 }
 0x675   :  { %v1535_v60 = vpop.f32.mrf.mxu1 }
 0x67d   :  { %v1538_v42 = vpop.f32.mrf.mxu1 }
 0x685   :  { %v1541_v52 = vpop.f32.mrf.mxu1 }
 0x686   :  { %1848 = vmatpush.msk.msrb.mxu2 %vm43_vm0, %v1541_v52 }
 0x688   :  { %1560 = vmatpush.msrb.mxu2 %v1538_v42 }
 0x68a   :  { %1561 = vmatpush.msrb.mxu2 %v1535_v60 }
 0x68c   :  { %1562 = vmatpush.msrb.mxu2 %v1532_v59 }
 0x68d   :  { %1849 = vmatmul.msk.f32.vlgmr.msrb.gmra.mxu2 %vm30_vm1, %v2125_v45 }
 0x695   :  { %1850 = vmatmul.msk.f32.gmra.mxu2 %vm30_vm1, %v2142_v48 }
 0x710   :  { %v1564_v55 = vpop.f32.mrf.mxu2 }
 0x711   :  { %v1570_v44 = vadd.f32 %v1564_v55, %v1510_v43 }
 0x713   :  { %v1572_v32 = vand.u32 2147483647, %v1570_v44 }
 0x715   :  { %v1574_v58 = vadd.f32 %v1572_v32, %v1386_v26 }
 0x717   :  { %v1578_v62 = vadd.f32 %v1576_v33, %v1574_v58 }
 0x718   :  { %v1567_v63 = vpop.f32.mrf.mxu2 }
 0x719   :  { %1581 = vst.msk [vmem:[#allocation2] sm:$0xff] %vm19_vm2, %v1578_v62  ;;  %v1571_v14 = vadd.f32 %v1567_v63, %v1513_v13 }
 0x71b   :  { %v1573_v36 = vand.u32 2147483647, %v1571_v14 }
 0x71d   :  { %v1575_v45 = vadd.f32 %v1573_v36, %v1387_v56 }
 0x71f   :  { %v1579_v15 = vadd.f32 %v1577_v53, %v1575_v45 }
 0x720   :  { %v1586_v48 = vld [vmem:[#allocation2] sm:$0xff] }
 0x721   :  { %1582 = vst.msk [vmem:[#allocation2 + $0x8] sm:$0xff] %vm19_vm2, %v1579_v15  ;;  %v1588_v1 = vsel %vm19_vm2, %v1586_v48, 0.0 }
 0x728   :  { %v1587_v17 = vld [vmem:[#allocation2 + $0x8] sm:$0xff] }
 0x729   :  { %v1589_v3 = vsel %vm19_vm2, %v1587_v17, 0.0 }
 0x72a   :  { %v1590_v5 = vadd.f32 %v1589_v3, %v1588_v1 }
 0x72c   :  { %1591 = vadd.xlane.f32.xlu0 %v1590_v5 }
 0x79f   :  { %v1592_v7 = vpop.xlane.xlu0 %1591 }
 0x7a0   :  { %v1593_v29 = vrot.slane %v1592_v7, 4 }
 0x7a2   :  { %v1594_v18 = vadd.f32 %v1593_v29, %v1592_v7 }
 0x7a4   :  { %v1595_v37 = vrot.slane %v1594_v18, 2 }
 0x7a6   :  { %v1596_v38 = vadd.f32 %v1595_v37, %v1594_v18 }
 0x7a8   :  { %v1597_v12 = vrot.slane %v1596_v38, 1 }
 0x7aa   :  { %v1598_v24 = vadd.f32 %v1597_v12, %v1596_v38 }
 0x7ac   :  { %1855 = vpush %v1598_v24 }
 0x7dd   :  { %s1856_s30 = spop %1855 }
 0x7de   :  { %v1600_v57 = vstv %s1856_s30 }
 0x7df   :  { %1602 = vst.msk [vmem:[#allocation3] sm:$0x1] %vm1601_vm3, %v1600_v57 }
 0x7e0   :  { %1613 = dma.vmem_to_hbm [thread:$0]  %s1609_s27, 16, %s1611_s29, [#allocation4]  }
 0x7e1   :  { %1883 = dma.done.wait [#allocation4], 16  }
 0x7e2   :  { %1884 = vsyncadd [#allocation4], 4294967280 }
 0x7e3   :  { %1618 = vsyncpa [#allocation4], 1 }

</bundles_post_ra>
